<compile_context>
chip_gen: v5e
topology: v5e:2x2
jax: 0.10.0
libtpu: 0.0.40
codegen_flags: <defaults>
</compile_context>

<pallas_src>
import math

import jax
import jax.numpy as jnp
from jax.experimental import pallas as pl
from jax.experimental.pallas import tpu as pltpu


# ----------------------------- kernel helpers -------------------------------


def _round_up(x, m):
    return (x + m - 1) // m * m


def _layernorm(x, w, b, eps=1e-5):
    mu = jnp.mean(x, axis=-1, keepdims=True)
    var = jnp.mean(jnp.square(x - mu), axis=-1, keepdims=True)
    return (x - mu) * jax.lax.rsqrt(var + eps) * w + b


def _softmax(x):
    m = jnp.max(x, axis=-1, keepdims=True)
    e = jnp.exp(x - m)
    return e * pl.reciprocal(jnp.sum(e, axis=-1, keepdims=True), approx=True)


def _quick_gelu(x):
    # CLIP/VIMA-style QuickGELU: x * sigmoid(1.702 * x)
    return x * jax.nn.sigmoid(1.702 * x)


def _make_vit_kernel(*, heads, width, tb, seq_len, dh):
    rows = tb * seq_len
    bf16 = jnp.bfloat16
    f32 = jnp.float32

    def kernel(patch_ref, w_patch_ref, pos_ref, ln_pre_w_ref, ln_pre_b_ref,
               w_qkv_ref, b_qkv_ref, w_o_ref, small_ref, w_fc_ref, b_fc_ref,
               w_pr_ref, ln_post_w_ref, ln_post_b_ref, proj_ref,
               out_ref, x_ref):
        layer = pl.program_id(1)

        # ---- first layer step: patch-embed + positional + ln_pre ----------
        @pl.when(layer == 0)
        def _():
            p = patch_ref[0]                                   # (rows, Dp_pad) bf16
            x0 = jnp.dot(p, w_patch_ref[...],
                         preferred_element_type=f32)           # (rows, W) f32
            x0 = (x0.reshape(tb, seq_len, width)
                  + pos_ref[...][None, :, :]).reshape(rows, width)
            x_ref[...] = _layernorm(x0, ln_pre_w_ref[...], ln_pre_b_ref[...])

        x = x_ref[...]                                          # (rows, W) f32

        # ---- unpack the small per-layer tensors (one fused DMA) -----------
        sp = small_ref[0]                                       # (6, W) f32
        ln1_w, ln1_b = sp[0:1], sp[1:2]
        b_o = sp[2:3]
        ln2_w, ln2_b = sp[3:4], sp[4:5]
        b_pr = sp[5:6]

        # ---- multi-head self-attention (pre-LN residual) -------------------
        h = _layernorm(x, ln1_w, ln1_b)
        hb = h.astype(bf16)
        # Full-width QKV projection; 1/sqrt(dh) is pre-folded into the Q part.
        qkv = jnp.dot(hb, w_qkv_ref[0],
                      preferred_element_type=f32) + b_qkv_ref[0]   # (rows, 3W)

        head_outs = []
        for hh in range(heads):                                 # static; small body
            q = qkv[:, 0 * width + hh * dh: 0 * width + (hh + 1) * dh]
            k = qkv[:, 1 * width + hh * dh: 1 * width + (hh + 1) * dh]
            v = qkv[:, 2 * width + hh * dh: 2 * width + (hh + 1) * dh]
            q3 = q.reshape(tb, seq_len, dh).astype(bf16)
            k3 = k.reshape(tb, seq_len, dh).astype(bf16)
            v3 = v.reshape(tb, seq_len, dh).astype(bf16)
            s = jnp.einsum("bqd,bkd->bqk", q3, k3,
                           preferred_element_type=f32)          # (tb, L, L)
            pr = _softmax(s)
            o = jnp.einsum("bqk,bkd->bqd", pr.astype(bf16), v3,
                           preferred_element_type=f32)
            head_outs.append(o.reshape(rows, dh).astype(bf16))

        attn_cat = jnp.concatenate(head_outs, axis=-1)          # (rows, W) bf16
        x = x + jnp.dot(attn_cat, w_o_ref[0],
                        preferred_element_type=f32) + b_o

        # ---- MLP (pre-LN residual, QuickGELU) ------------------------------
        h = _layernorm(x, ln2_w, ln2_b)
        h = jnp.dot(h.astype(bf16), w_fc_ref[0],
                    preferred_element_type=f32) + b_fc_ref[0]
        h = _quick_gelu(h)
        h = jnp.dot(h.astype(bf16), w_pr_ref[0],
                    preferred_element_type=f32) + b_pr
        x = x + h
        x_ref[...] = x

        # ---- last layer step: ln_post + projection (lane-dense store) ------
        @pl.when(layer == pl.num_programs(1) - 1)
        def _():
            y = _layernorm(x, ln_post_w_ref[...], ln_post_b_ref[...])
            out = jnp.dot(y.astype(bf16), proj_ref[...],
                          preferred_element_type=f32)
            out_ref[0] = out.astype(out_ref.dtype)

    return kernel


# ----------------------------- pallas wrapper --------------------------------


def _pick_tb(n, seq_len, target_rows=512):
    tb = max(1, min(n, max(1, target_rows // max(seq_len, 1))))
    if n >= 2:
        # keep at least 2 image blocks so the "parallel" axis can feed both
        # TensorCores on dual-TC parts (v7x).
        tb = max(1, min(tb, n // 2))
    while n % tb:
        tb -= 1
    return tb


def _vmem_limit_bytes():
    """Per-generation VMEM budget: 3/4 of physical, capped at 96 MiB."""
    cap = 128 * 1024 * 1024
    try:
        info = pltpu.get_tpu_info()
        for attr in ("vmem_capacity_bytes", "vmem_bytes", "vmem_size_bytes"):
            v = getattr(info, attr, None)
            if v:
                cap = int(v)
                break
    except Exception:
        pass
    return int(min(96 * 1024 * 1024, max(32 * 1024 * 1024, (cap * 3) // 4)))


def vit_encode_pallas(patches, params, *, layers, heads, width, emb_dim,
                      tb=None, target_rows=512):
    """patches: (N, L, 3*P*P) float32  ->  (N, L, emb_dim) float32."""
    f32, bf16 = jnp.float32, jnp.bfloat16
    N, L, Dp = patches.shape
    assert width % heads == 0
    dh = width // heads
    dp_pad = _round_up(Dp, 128)
    e_pad = _round_up(emb_dim, 128)
    if tb is None:
        tb = _pick_tb(N, L, target_rows=target_rows)
    assert N % tb == 0, (N, tb)
    rows = tb * L
    n_blk = N // tb

    # --- lane-dense, bf16 matmul inputs -------------------------------------
    patches_p = jnp.pad(patches, ((0, 0), (0, 0), (0, dp_pad - Dp)))
    patches_p = patches_p.astype(bf16).reshape(n_blk, rows, dp_pad)

    w_patch = jnp.pad(params["w_patch"],
                      ((0, dp_pad - Dp), (0, 0))).astype(bf16)
    pos = params["pos"].astype(f32)                               # (L, W)
    proj_p = jnp.pad(params["proj"],
                     ((0, 0), (0, e_pad - emb_dim))).astype(bf16)

    # --- fold the 1/sqrt(dh) attention scale into the Q projection ----------
    scale = 1.0 / math.sqrt(dh)
    q_scale = jnp.concatenate(
        [jnp.full((width,), scale, f32), jnp.ones((2 * width,), f32)])
    w_qkv_s = (params["w_qkv"] * q_scale[None, None, :]).astype(bf16)
    b_qkv_s = (params["b_qkv"] * q_scale[None, None, :]).astype(f32)

    # --- pack the tiny per-layer tensors into one array (one DMA / layer) ---
    small = jnp.stack(
        [params["ln1_w"][:, 0], params["ln1_b"][:, 0], params["b_o"][:, 0],
         params["ln2_w"][:, 0], params["ln2_b"][:, 0], params["b_pr"][:, 0]],
        axis=1).astype(f32)                                       # (Ly, 6, W)

    consts_pre = [w_patch, pos,
                  params["ln_pre_w"].astype(f32),
                  params["ln_pre_b"].astype(f32)]
    per_layer = [w_qkv_s, b_qkv_s,
                 params["w_o"].astype(bf16),
                 small,
                 params["w_fc"].astype(bf16),
                 params["b_fc"].astype(f32),
                 params["w_pr"].astype(bf16)]
    consts_post = [params["ln_post_w"].astype(f32),
                   params["ln_post_b"].astype(f32), proj_p]

    def const_spec(a):
        nd = a.ndim
        return pl.BlockSpec(a.shape, lambda i, l, _n=nd: (0,) * _n)

    def layer_spec(a):
        # streamed one layer at a time along the (inner, "arbitrary") grid axis
        nd = a.ndim
        return pl.BlockSpec((1,) + a.shape[1:],
                            lambda i, l, _n=nd: (l,) + (0,) * (_n - 1))

    in_specs = ([pl.BlockSpec((1, rows, dp_pad), lambda i, l: (i, 0, 0))]
                + [const_spec(a) for a in consts_pre]
                + [layer_spec(a) for a in per_layer]
                + [const_spec(a) for a in consts_post])
    out_specs = pl.BlockSpec((1, rows, e_pad), lambda i, l: (i, 0, 0))

    kernel = _make_vit_kernel(heads=heads, width=width, tb=tb, seq_len=L,
                              dh=dh)

    out = pl.pallas_call(
        kernel,
        out_shape=jax.ShapeDtypeStruct((n_blk, rows, e_pad), f32),
        grid_spec=pltpu.PrefetchScalarGridSpec(
            num_scalar_prefetch=0,
            grid=(n_blk, layers),
            in_specs=in_specs,
            out_specs=out_specs,
            scratch_shapes=[pltpu.VMEM((rows, width), f32)],   # x carried over layers
        ),
        compiler_params=pltpu.CompilerParams(
            dimension_semantics=("parallel", "arbitrary"),
            vmem_limit_bytes=_vmem_limit_bytes(),
        ),
    )(patches_p, *consts_pre, *per_layer, *consts_post)

    return out.reshape(N, L, e_pad)[..., :emb_dim]


def extract_patches(imgs, patch_size):
    """imgs: (N, 3, H, W) NCHW  ->  (N, (H/P)*(W/P), 3*P*P) in (c, ph, pw) order."""
    N, C, H, W = imgs.shape
    P = patch_size
    gh, gw = H // P, W // P
    x = imgs.reshape(N, C, gh, P, gw, P)
    x = x.transpose(0, 2, 4, 1, 3, 5)          # (N, gh, gw, C, P, P)
    return x.reshape(N, gh * gw, C * P * P)


def gato_multi_view_rgb_encoder(rgb, params, *, patch_size, layers, heads,
                                width, emb_dim, tb=None):
    """rgb: dict view -> (..., 3, H, W).  Returns (..., L * n_views, emb_dim)."""
    views = sorted(rgb.keys())
    imgs = jnp.stack([rgb[v] for v in views], axis=0)   # (V, ..., 3, H, W)
    V = imgs.shape[0]
    lead = imgs.shape[1:-3]
    C, H, W = imgs.shape[-3:]
    flat = imgs.reshape((-1, C, H, W))
    patches = extract_patches(flat, patch_size)
    feats = vit_encode_pallas(patches, params, layers=layers, heads=heads,
                              width=width, emb_dim=emb_dim, tb=tb)
    L = feats.shape[-2]
    feats = feats.reshape((V,) + lead + (L, emb_dim))
    # torch.concat([...], dim=-2) over sorted views.
    return jnp.concatenate([feats[i] for i in range(V)], axis=-2)


# ----------------------------- params & reference ---------------------------


def init_params(key, *, width, layers, emb_dim, patch_size, img_size):
    P = patch_size
    Dp = 3 * P * P
    L = (img_size[0] // P) * (img_size[1] // P)
    ks = jax.random.split(key, 12)

    def normal(k, shape, std):
        return (std * jax.random.normal(k, shape)).astype(jnp.float32)

    scale = width ** -0.5
    return {
        "w_patch": normal(ks[0], (Dp, width), 0.02),
        "pos": normal(ks[1], (L, width), scale),
        "ln_pre_w": jnp.ones((1, width), jnp.float32),
        "ln_pre_b": jnp.zeros((1, width), jnp.float32),
        "ln1_w": jnp.ones((layers, 1, width), jnp.float32),
        "ln1_b": jnp.zeros((layers, 1, width), jnp.float32),
        "w_qkv": normal(ks[2], (layers, width, 3 * width), 0.02),
        "b_qkv": normal(ks[3], (layers, 1, 3 * width), 0.02),
        "w_o": normal(ks[4], (layers, width, width), 0.02),
        "b_o": normal(ks[5], (layers, 1, width), 0.02),
        "ln2_w": jnp.ones((layers, 1, width), jnp.float32),
        "ln2_b": jnp.zeros((layers, 1, width), jnp.float32),
        "w_fc": normal(ks[6], (layers, width, 4 * width), 0.02),
        "b_fc": normal(ks[7], (layers, 1, 4 * width), 0.02),
        "w_pr": normal(ks[8], (layers, 4 * width, width), 0.02),
        "b_pr": normal(ks[9], (layers, 1, width), 0.02),
        "ln_post_w": jnp.ones((1, width), jnp.float32),
        "ln_post_b": jnp.zeros((1, width), jnp.float32),
        "proj": normal(ks[10], (width, emb_dim), scale),
    }


def _vit_reference(patches, params, *, layers, heads, width):
    """Pure-JAX reference with the same bf16-matmul/f32-accumulate recipe."""
    bf16 = jnp.bfloat16
    dh = width // heads

    def ln(x, w, b):
        mu = x.mean(-1, keepdims=True)
        var = ((x - mu) ** 2).mean(-1, keepdims=True)
        return (x - mu) / jnp.sqrt(var + 1e-5) * w + b

    def mm(a, w):
        return jnp.dot(a.astype(bf16), w.astype(bf16),
                       preferred_element_type=jnp.float32)

    x = mm(patches, params["w_patch"]) + params["pos"]
    x = ln(x, params["ln_pre_w"][0], params["ln_pre_b"][0])
    N, L, _ = x.shape
    for l in range(layers):
        h = ln(x, params["ln1_w"][l, 0], params["ln1_b"][l, 0])
        qkv = mm(h, params["w_qkv"][l]) + params["b_qkv"][l, 0]
        q, k, v = jnp.split(qkv, 3, axis=-1)
        q = q.reshape(N, L, heads, dh).transpose(0, 2, 1, 3)
        k = k.reshape(N, L, heads, dh).transpose(0, 2, 1, 3)
        v = v.reshape(N, L, heads, dh).transpose(0, 2, 1, 3)
        s = jnp.einsum("nhqd,nhkd->nhqk", q.astype(bf16), k.astype(bf16),
                       preferred_element_type=jnp.float32) / math.sqrt(dh)
        p = jax.nn.softmax(s, axis=-1)
        o = jnp.einsum("nhqk,nhkd->nhqd", p.astype(bf16), v.astype(bf16),
                       preferred_element_type=jnp.float32)
        o = o.transpose(0, 2, 1, 3).reshape(N, L, width)
        o = mm(o, params["w_o"][l]) + params["b_o"][l, 0]
        x = x + o
        h = ln(x, params["ln2_w"][l, 0], params["ln2_b"][l, 0])
        h = mm(h, params["w_fc"][l]) + params["b_fc"][l, 0]
        h = h * jax.nn.sigmoid(1.702 * h)
        h = mm(h, params["w_pr"][l]) + params["b_pr"][l, 0]
        x = x + h
    x = ln(x, params["ln_post_w"][0], params["ln_post_b"][0])
    return mm(x, params["proj"])


# ----------------------------------- main ------------------------------------

if __name__ == "__main__":
    emb_dim, width, layers, heads = 32, 32, 2, 2
    patch_size, img_size = 4, (16, 16)
    B = 2
    views = ["front", "top"]

    key = jax.random.PRNGKey(0)
    k_params, k_front, k_top = jax.random.split(key, 3)
    params = init_params(k_params, width=width, layers=layers,
                         emb_dim=emb_dim, patch_size=patch_size,
                         img_size=img_size)
    rgb = {
        "front": jax.random.uniform(k_front, (B, 3, *img_size), jnp.float32),
        "top": jax.random.uniform(k_top, (B, 3, *img_size), jnp.float32),
    }

    out = gato_multi_view_rgb_encoder(rgb, params, patch_size=patch_size,
                                      layers=layers, heads=heads,
                                      width=width, emb_dim=emb_dim, tb=None)
    out = jax.block_until_ready(out)

    L = (img_size[0] // patch_size) * (img_size[1] // patch_size)
    assert out.shape == (B, L * len(views), emb_dim), out.shape
    assert bool(jnp.all(jnp.isfinite(out)))

    # sanity check against a pure-JAX reference (same bf16-matmul recipe)
    flat = jnp.stack([rgb[v] for v in sorted(views)], 0).reshape(-1, 3, *img_size)
    ref_feats = _vit_reference(extract_patches(flat, patch_size), params,
                               layers=layers, heads=heads, width=width)
    ref = jnp.concatenate(
        [ref_feats.reshape(len(views), B, L, emb_dim)[i]
         for i in range(len(views))], axis=-2)
    max_err = float(jnp.max(jnp.abs(out - ref)))
    assert max_err < 3e-2, f"mismatch vs reference: {max_err}"

    print("KERNEL_OK")
</pallas_src>

<mosaic_0001>
module attributes {stable_mosaic.version = 11 : i64} {
  func.func @kernel(%arg0: i32, %arg1: i32, %arg2: memref<1x32x128xbf16, #tpu.memory_space<vmem>>, %arg3: memref<128x32xbf16, #tpu.memory_space<vmem>>, %arg4: memref<16x32xf32, #tpu.memory_space<vmem>>, %arg5: memref<1x32xf32, #tpu.memory_space<vmem>>, %arg6: memref<1x32xf32, #tpu.memory_space<vmem>>, %arg7: memref<1x32x96xbf16, #tpu.memory_space<vmem>>, %arg8: memref<1x1x96xf32, #tpu.memory_space<vmem>>, %arg9: memref<1x32x32xbf16, #tpu.memory_space<vmem>>, %arg10: memref<1x6x32xf32, #tpu.memory_space<vmem>>, %arg11: memref<1x32x128xbf16, #tpu.memory_space<vmem>>, %arg12: memref<1x1x128xf32, #tpu.memory_space<vmem>>, %arg13: memref<1x128x32xbf16, #tpu.memory_space<vmem>>, %arg14: memref<1x32xf32, #tpu.memory_space<vmem>>, %arg15: memref<1x32xf32, #tpu.memory_space<vmem>>, %arg16: memref<32x128xbf16, #tpu.memory_space<vmem>>, %arg17: memref<1x32x128xf32, #tpu.memory_space<vmem>>, %arg18: memref<32x32xf32, #tpu.memory_space<vmem>>) attributes {dimension_semantics = [#tpu.dimension_semantics<parallel>, #tpu.dimension_semantics<arbitrary>], iteration_bounds = array<i64: 2, 2>, scalar_prefetch = 0 : i64, scratch_operands = 1 : i64, tpu.core_type = #tpu.core_type<tc>, window_params = [{transform_indices = @transform_0, window_bounds = array<i64: 1, 32, 128>}, {pipeline_mode = #tpu.pipeline_mode<synchronous>, transform_indices = @transform_1, window_bounds = array<i64: 128, 32>}, {pipeline_mode = #tpu.pipeline_mode<synchronous>, transform_indices = @transform_2, window_bounds = array<i64: 16, 32>}, {pipeline_mode = #tpu.pipeline_mode<synchronous>, transform_indices = @transform_3, window_bounds = array<i64: 1, 32>}, {pipeline_mode = #tpu.pipeline_mode<synchronous>, transform_indices = @transform_4, window_bounds = array<i64: 1, 32>}, {transform_indices = @transform_5, window_bounds = array<i64: 1, 32, 96>}, {transform_indices = @transform_6, window_bounds = array<i64: 1, 1, 96>}, {transform_indices = @transform_7, window_bounds = array<i64: 1, 32, 32>}, {transform_indices = @transform_8, window_bounds = array<i64: 1, 6, 32>}, {transform_indices = @transform_9, window_bounds = array<i64: 1, 32, 128>}, {transform_indices = @transform_10, window_bounds = array<i64: 1, 1, 128>}, {transform_indices = @transform_11, window_bounds = array<i64: 1, 128, 32>}, {pipeline_mode = #tpu.pipeline_mode<synchronous>, transform_indices = @transform_12, window_bounds = array<i64: 1, 32>}, {pipeline_mode = #tpu.pipeline_mode<synchronous>, transform_indices = @transform_13, window_bounds = array<i64: 1, 32>}, {pipeline_mode = #tpu.pipeline_mode<synchronous>, transform_indices = @transform_14, window_bounds = array<i64: 32, 128>}, {transform_indices = @transform_15, window_bounds = array<i64: 1, 32, 128>}]} {
    %c0_i32 = arith.constant 0 : i32
    %0 = arith.cmpi eq, %arg1, %c0_i32 : i32
    %1 = arith.extui %0 : i1 to i32
    %c0_i32_0 = arith.constant 0 : i32
    %2 = arith.cmpi ne, %1, %c0_i32_0 : i32
    scf.if %2 {
      %c0_49 = arith.constant 0 : index
      %c0_50 = arith.constant 0 : index
      %c0_51 = arith.constant 0 : index
      %146 = vector.load %arg2[%c0_49, %c0_50, %c0_51] : memref<1x32x128xbf16, #tpu.memory_space<vmem>>, vector<1x32x128xbf16>
      %147 = vector.shape_cast %146 : vector<1x32x128xbf16> to vector<32x128xbf16>
      %c0_52 = arith.constant 0 : index
      %c0_53 = arith.constant 0 : index
      %148 = vector.load %arg3[%c0_52, %c0_53] : memref<128x32xbf16, #tpu.memory_space<vmem>>, vector<128x32xbf16>
      %cst_54 = arith.constant dense<0.000000e+00> : vector<32x32xf32>
      %149 = tpu.matmul %147, %148, %cst_54 {dimension_numbers = #tpu.dot_dimension_numbers<[1], [0], [0], [1], [0, 0, 1, 1], [], []>} : vector<32x128xbf16>, vector<128x32xbf16>, vector<32x32xf32> -> vector<32x32xf32>
      %150 = vector.shape_cast %149 : vector<32x32xf32> to vector<2x16x32xf32>
      %c0_55 = arith.constant 0 : index
      %c0_56 = arith.constant 0 : index
      %151 = vector.load %arg4[%c0_55, %c0_56] : memref<16x32xf32, #tpu.memory_space<vmem>>, vector<16x32xf32>
      %152 = vector.shape_cast %151 : vector<16x32xf32> to vector<1x16x32xf32>
      %153 = vector.broadcast %152 : vector<1x16x32xf32> to vector<2x16x32xf32>
      %154 = arith.addf %150, %153 : vector<2x16x32xf32>
      %155 = vector.shape_cast %154 : vector<2x16x32xf32> to vector<32x32xf32>
      %c0_57 = arith.constant 0 : index
      %c0_58 = arith.constant 0 : index
      %156 = vector.load %arg5[%c0_57, %c0_58] : memref<1x32xf32, #tpu.memory_space<vmem>>, vector<1x32xf32>
      %c0_59 = arith.constant 0 : index
      %c0_60 = arith.constant 0 : index
      %157 = vector.load %arg6[%c0_59, %c0_60] : memref<1x32xf32, #tpu.memory_space<vmem>>, vector<1x32xf32>
      %cst_61 = arith.constant dense<0.000000e+00> : vector<32xf32>
      %158 = vector.multi_reduction <add>, %155, %cst_61 [1] : vector<32x32xf32> to vector<32xf32>
      %159 = vector.shape_cast %158 : vector<32xf32> to vector<32x1xf32>
      %cst_62 = arith.constant 3.200000e+01 : f32
      %160 = vector.broadcast %cst_62 : f32 to vector<32x1xf32>
      %161 = arith.divf %159, %160 : vector<32x1xf32>
      %162 = vector.broadcast %161 : vector<32x1xf32> to vector<32x32xf32>
      %163 = arith.subf %155, %162 : vector<32x32xf32>
      %164 = arith.mulf %163, %163 : vector<32x32xf32>
      %cst_63 = arith.constant dense<0.000000e+00> : vector<32xf32>
      %165 = vector.multi_reduction <add>, %164, %cst_63 [1] : vector<32x32xf32> to vector<32xf32>
      %166 = vector.shape_cast %165 : vector<32xf32> to vector<32x1xf32>
      %cst_64 = arith.constant 3.200000e+01 : f32
      %167 = vector.broadcast %cst_64 : f32 to vector<32x1xf32>
      %168 = arith.divf %166, %167 : vector<32x1xf32>
      %169 = vector.broadcast %161 : vector<32x1xf32> to vector<32x32xf32>
      %170 = arith.subf %155, %169 : vector<32x32xf32>
      %cst_65 = arith.constant 9.99999974E-6 : f32
      %171 = vector.broadcast %cst_65 : f32 to vector<32x1xf32>
      %172 = arith.addf %168, %171 : vector<32x1xf32>
      %173 = math.rsqrt %172 : vector<32x1xf32>
      %174 = vector.broadcast %173 : vector<32x1xf32> to vector<32x32xf32>
      %175 = arith.mulf %170, %174 : vector<32x32xf32>
      %176 = vector.broadcast %156 : vector<1x32xf32> to vector<32x32xf32>
      %177 = arith.mulf %175, %176 : vector<32x32xf32>
      %178 = vector.broadcast %157 : vector<1x32xf32> to vector<32x32xf32>
      %179 = arith.addf %177, %178 : vector<32x32xf32>
      %c0_66 = arith.constant 0 : index
      %c0_67 = arith.constant 0 : index
      %180 = vector.load %arg18[%c0_66, %c0_67] : memref<32x32xf32, #tpu.memory_space<vmem>>, vector<32x32xf32>
      tpu.vector_store %arg18[%c0_66, %c0_67], %179 {strides = array<i32>} : memref<32x32xf32, #tpu.memory_space<vmem>>, vector<32x32xf32>,
    } else {
    }
    %c0 = arith.constant 0 : index
    %c0_1 = arith.constant 0 : index
    %3 = vector.load %arg18[%c0, %c0_1] : memref<32x32xf32, #tpu.memory_space<vmem>>, vector<32x32xf32>
    %c0_2 = arith.constant 0 : index
    %c0_3 = arith.constant 0 : index
    %c0_4 = arith.constant 0 : index
    %4 = vector.load %arg10[%c0_2, %c0_3, %c0_4] : memref<1x6x32xf32, #tpu.memory_space<vmem>>, vector<1x6x32xf32>
    %5 = vector.shape_cast %4 : vector<1x6x32xf32> to vector<6x32xf32>
    %6 = vector.extract_strided_slice %5 {offsets = [0, 0], sizes = [1, 32], strides = [1, 1]} : vector<6x32xf32> to vector<1x32xf32>
    %7 = vector.extract_strided_slice %5 {offsets = [1, 0], sizes = [1, 32], strides = [1, 1]} : vector<6x32xf32> to vector<1x32xf32>
    %8 = vector.extract_strided_slice %5 {offsets = [2, 0], sizes = [1, 32], strides = [1, 1]} : vector<6x32xf32> to vector<1x32xf32>
    %9 = vector.extract_strided_slice %5 {offsets = [3, 0], sizes = [1, 32], strides = [1, 1]} : vector<6x32xf32> to vector<1x32xf32>
    %10 = vector.extract_strided_slice %5 {offsets = [4, 0], sizes = [1, 32], strides = [1, 1]} : vector<6x32xf32> to vector<1x32xf32>
    %11 = vector.extract_strided_slice %5 {offsets = [5, 0], sizes = [1, 32], strides = [1, 1]} : vector<6x32xf32> to vector<1x32xf32>
    %cst = arith.constant dense<0.000000e+00> : vector<32xf32>
    %12 = vector.multi_reduction <add>, %3, %cst [1] : vector<32x32xf32> to vector<32xf32>
    %13 = vector.shape_cast %12 : vector<32xf32> to vector<32x1xf32>
    %cst_5 = arith.constant 3.200000e+01 : f32
    %14 = vector.broadcast %cst_5 : f32 to vector<32x1xf32>
    %15 = arith.divf %13, %14 : vector<32x1xf32>
    %16 = vector.broadcast %15 : vector<32x1xf32> to vector<32x32xf32>
    %17 = arith.subf %3, %16 : vector<32x32xf32>
    %18 = arith.mulf %17, %17 : vector<32x32xf32>
    %cst_6 = arith.constant dense<0.000000e+00> : vector<32xf32>
    %19 = vector.multi_reduction <add>, %18, %cst_6 [1] : vector<32x32xf32> to vector<32xf32>
    %20 = vector.shape_cast %19 : vector<32xf32> to vector<32x1xf32>
    %cst_7 = arith.constant 3.200000e+01 : f32
    %21 = vector.broadcast %cst_7 : f32 to vector<32x1xf32>
    %22 = arith.divf %20, %21 : vector<32x1xf32>
    %23 = vector.broadcast %15 : vector<32x1xf32> to vector<32x32xf32>
    %24 = arith.subf %3, %23 : vector<32x32xf32>
    %cst_8 = arith.constant 9.99999974E-6 : f32
    %25 = vector.broadcast %cst_8 : f32 to vector<32x1xf32>
    %26 = arith.addf %22, %25 : vector<32x1xf32>
    %27 = math.rsqrt %26 : vector<32x1xf32>
    %28 = vector.broadcast %27 : vector<32x1xf32> to vector<32x32xf32>
    %29 = arith.mulf %24, %28 : vector<32x32xf32>
    %30 = vector.broadcast %6 : vector<1x32xf32> to vector<32x32xf32>
    %31 = arith.mulf %29, %30 : vector<32x32xf32>
    %32 = vector.broadcast %7 : vector<1x32xf32> to vector<32x32xf32>
    %33 = arith.addf %31, %32 : vector<32x32xf32>
    %34 = arith.truncf %33 : vector<32x32xf32> to vector<32x32xbf16>
    %c0_9 = arith.constant 0 : index
    %c0_10 = arith.constant 0 : index
    %c0_11 = arith.constant 0 : index
    %35 = vector.load %arg7[%c0_9, %c0_10, %c0_11] : memref<1x32x96xbf16, #tpu.memory_space<vmem>>, vector<1x32x96xbf16>
    %36 = vector.shape_cast %35 : vector<1x32x96xbf16> to vector<32x96xbf16>
    %cst_12 = arith.constant dense<0.000000e+00> : vector<32x96xf32>
    %37 = tpu.matmul %34, %36, %cst_12 {dimension_numbers = #tpu.dot_dimension_numbers<[1], [0], [0], [1], [0, 0, 1, 1], [], []>} : vector<32x32xbf16>, vector<32x96xbf16>, vector<32x96xf32> -> vector<32x96xf32>
    %c0_13 = arith.constant 0 : index
    %c0_14 = arith.constant 0 : index
    %c0_15 = arith.constant 0 : index
    %38 = vector.load %arg8[%c0_13, %c0_14, %c0_15] : memref<1x1x96xf32, #tpu.memory_space<vmem>>, vector<1x1x96xf32>
    %39 = vector.shape_cast %38 : vector<1x1x96xf32> to vector<1x96xf32>
    %40 = vector.broadcast %39 : vector<1x96xf32> to vector<32x96xf32>
    %41 = arith.addf %37, %40 : vector<32x96xf32>
    %42 = vector.extract_strided_slice %41 {offsets = [0, 0], sizes = [32, 16], strides = [1, 1]} : vector<32x96xf32> to vector<32x16xf32>
    %43 = vector.extract_strided_slice %41 {offsets = [0, 32], sizes = [32, 16], strides = [1, 1]} : vector<32x96xf32> to vector<32x16xf32>
    %44 = vector.extract_strided_slice %41 {offsets = [0, 64], sizes = [32, 16], strides = [1, 1]} : vector<32x96xf32> to vector<32x16xf32>
    %45 = vector.shape_cast %42 : vector<32x16xf32> to vector<2x16x16xf32>
    %46 = arith.truncf %45 : vector<2x16x16xf32> to vector<2x16x16xbf16>
    %47 = vector.shape_cast %43 : vector<32x16xf32> to vector<2x16x16xf32>
    %48 = arith.truncf %47 : vector<2x16x16xf32> to vector<2x16x16xbf16>
    %49 = vector.shape_cast %44 : vector<32x16xf32> to vector<2x16x16xf32>
    %50 = arith.truncf %49 : vector<2x16x16xf32> to vector<2x16x16xbf16>
    "tpu.trace_start"() <{level = 10 : i32, message = "bqd,bkd->bqk"}> : () -> ()
    %cst_16 = arith.constant dense<0.000000e+00> : vector<2x16x16xf32>
    %51 = tpu.matmul %46, %48, %cst_16 {dimension_numbers = #tpu.dot_dimension_numbers<[2], [2], [1], [1], [0, 0, 0, 1, 1, 1], [0], [0]>} : vector<2x16x16xbf16>, vector<2x16x16xbf16>, vector<2x16x16xf32> -> vector<2x16x16xf32>
    "tpu.trace_stop"() : () -> ()
    %cst_17 = arith.constant dense<0xFF800000> : vector<2x16xf32>
    %52 = vector.multi_reduction <maximumf>, %51, %cst_17 [2] : vector<2x16x16xf32> to vector<2x16xf32>
    %53 = vector.shape_cast %52 : vector<2x16xf32> to vector<2x16x1xf32>
    %54 = vector.broadcast %53 : vector<2x16x1xf32> to vector<2x16x16xf32>
    %55 = arith.subf %51, %54 : vector<2x16x16xf32>
    %56 = math.exp %55 : vector<2x16x16xf32>
    %cst_18 = arith.constant dense<0.000000e+00> : vector<2x16xf32>
    %57 = vector.multi_reduction <add>, %56, %cst_18 [2] : vector<2x16x16xf32> to vector<2x16xf32>
    %58 = vector.shape_cast %57 : vector<2x16xf32> to vector<2x16x1xf32>
    %59 = tpu.reciprocal %58 {approx = true} : vector<2x16x1xf32> -> vector<2x16x1xf32>
    %60 = vector.broadcast %59 : vector<2x16x1xf32> to vector<2x16x16xf32>
    %61 = arith.mulf %56, %60 : vector<2x16x16xf32>
    %62 = arith.truncf %61 : vector<2x16x16xf32> to vector<2x16x16xbf16>
    "tpu.trace_start"() <{level = 10 : i32, message = "bqk,bkd->bqd"}> : () -> ()
    %cst_19 = arith.constant dense<0.000000e+00> : vector<2x16x16xf32>
    %63 = tpu.matmul %62, %50, %cst_19 {dimension_numbers = #tpu.dot_dimension_numbers<[2], [1], [1], [2], [0, 0, 0, 1, 1, 2], [0], [0]>} : vector<2x16x16xbf16>, vector<2x16x16xbf16>, vector<2x16x16xf32> -> vector<2x16x16xf32>
    "tpu.trace_stop"() : () -> ()
    %64 = vector.shape_cast %63 : vector<2x16x16xf32> to vector<32x16xf32>
    %65 = arith.truncf %64 : vector<32x16xf32> to vector<32x16xbf16>
    %66 = vector.extract_strided_slice %41 {offsets = [0, 16], sizes = [32, 16], strides = [1, 1]} : vector<32x96xf32> to vector<32x16xf32>
    %67 = vector.extract_strided_slice %41 {offsets = [0, 48], sizes = [32, 16], strides = [1, 1]} : vector<32x96xf32> to vector<32x16xf32>
    %68 = vector.extract_strided_slice %41 {offsets = [0, 80], sizes = [32, 16], strides = [1, 1]} : vector<32x96xf32> to vector<32x16xf32>
    %69 = vector.shape_cast %66 : vector<32x16xf32> to vector<2x16x16xf32>
    %70 = arith.truncf %69 : vector<2x16x16xf32> to vector<2x16x16xbf16>
    %71 = vector.shape_cast %67 : vector<32x16xf32> to vector<2x16x16xf32>
    %72 = arith.truncf %71 : vector<2x16x16xf32> to vector<2x16x16xbf16>
    %73 = vector.shape_cast %68 : vector<32x16xf32> to vector<2x16x16xf32>
    %74 = arith.truncf %73 : vector<2x16x16xf32> to vector<2x16x16xbf16>
    "tpu.trace_start"() <{level = 10 : i32, message = "bqd,bkd->bqk"}> : () -> ()
    %cst_20 = arith.constant dense<0.000000e+00> : vector<2x16x16xf32>
    %75 = tpu.matmul %70, %72, %cst_20 {dimension_numbers = #tpu.dot_dimension_numbers<[2], [2], [1], [1], [0, 0, 0, 1, 1, 1], [0], [0]>} : vector<2x16x16xbf16>, vector<2x16x16xbf16>, vector<2x16x16xf32> -> vector<2x16x16xf32>
    "tpu.trace_stop"() : () -> ()
    %cst_21 = arith.constant dense<0xFF800000> : vector<2x16xf32>
    %76 = vector.multi_reduction <maximumf>, %75, %cst_21 [2] : vector<2x16x16xf32> to vector<2x16xf32>
    %77 = vector.shape_cast %76 : vector<2x16xf32> to vector<2x16x1xf32>
    %78 = vector.broadcast %77 : vector<2x16x1xf32> to vector<2x16x16xf32>
    %79 = arith.subf %75, %78 : vector<2x16x16xf32>
    %80 = math.exp %79 : vector<2x16x16xf32>
    %cst_22 = arith.constant dense<0.000000e+00> : vector<2x16xf32>
    %81 = vector.multi_reduction <add>, %80, %cst_22 [2] : vector<2x16x16xf32> to vector<2x16xf32>
    %82 = vector.shape_cast %81 : vector<2x16xf32> to vector<2x16x1xf32>
    %83 = tpu.reciprocal %82 {approx = true} : vector<2x16x1xf32> -> vector<2x16x1xf32>
    %84 = vector.broadcast %83 : vector<2x16x1xf32> to vector<2x16x16xf32>
    %85 = arith.mulf %80, %84 : vector<2x16x16xf32>
    %86 = arith.truncf %85 : vector<2x16x16xf32> to vector<2x16x16xbf16>
    "tpu.trace_start"() <{level = 10 : i32, message = "bqk,bkd->bqd"}> : () -> ()
    %cst_23 = arith.constant dense<0.000000e+00> : vector<2x16x16xf32>
    %87 = tpu.matmul %86, %74, %cst_23 {dimension_numbers = #tpu.dot_dimension_numbers<[2], [1], [1], [2], [0, 0, 0, 1, 1, 2], [0], [0]>} : vector<2x16x16xbf16>, vector<2x16x16xbf16>, vector<2x16x16xf32> -> vector<2x16x16xf32>
    "tpu.trace_stop"() : () -> ()
    %88 = vector.shape_cast %87 : vector<2x16x16xf32> to vector<32x16xf32>
    %89 = arith.truncf %88 : vector<32x16xf32> to vector<32x16xbf16>
    %90 = tpu.concatenate %65, %89 in 1 : vector<32x16xbf16>, vector<32x16xbf16> -> vector<32x32xbf16>
    %c0_24 = arith.constant 0 : index
    %c0_25 = arith.constant 0 : index
    %c0_26 = arith.constant 0 : index
    %91 = vector.load %arg9[%c0_24, %c0_25, %c0_26] : memref<1x32x32xbf16, #tpu.memory_space<vmem>>, vector<1x32x32xbf16>
    %92 = vector.shape_cast %91 : vector<1x32x32xbf16> to vector<32x32xbf16>
    %cst_27 = arith.constant dense<0.000000e+00> : vector<32x32xf32>
    %93 = tpu.matmul %90, %92, %cst_27 {dimension_numbers = #tpu.dot_dimension_numbers<[1], [0], [0], [1], [0, 0, 1, 1], [], []>} : vector<32x32xbf16>, vector<32x32xbf16>, vector<32x32xf32> -> vector<32x32xf32>
    %94 = arith.addf %3, %93 : vector<32x32xf32>
    %95 = vector.broadcast %8 : vector<1x32xf32> to vector<32x32xf32>
    %96 = arith.addf %94, %95 : vector<32x32xf32>
    %cst_28 = arith.constant dense<0.000000e+00> : vector<32xf32>
    %97 = vector.multi_reduction <add>, %96, %cst_28 [1] : vector<32x32xf32> to vector<32xf32>
    %98 = vector.shape_cast %97 : vector<32xf32> to vector<32x1xf32>
    %cst_29 = arith.constant 3.200000e+01 : f32
    %99 = vector.broadcast %cst_29 : f32 to vector<32x1xf32>
    %100 = arith.divf %98, %99 : vector<32x1xf32>
    %101 = vector.broadcast %100 : vector<32x1xf32> to vector<32x32xf32>
    %102 = arith.subf %96, %101 : vector<32x32xf32>
    %103 = arith.mulf %102, %102 : vector<32x32xf32>
    %cst_30 = arith.constant dense<0.000000e+00> : vector<32xf32>
    %104 = vector.multi_reduction <add>, %103, %cst_30 [1] : vector<32x32xf32> to vector<32xf32>
    %105 = vector.shape_cast %104 : vector<32xf32> to vector<32x1xf32>
    %cst_31 = arith.constant 3.200000e+01 : f32
    %106 = vector.broadcast %cst_31 : f32 to vector<32x1xf32>
    %107 = arith.divf %105, %106 : vector<32x1xf32>
    %108 = vector.broadcast %100 : vector<32x1xf32> to vector<32x32xf32>
    %109 = arith.subf %96, %108 : vector<32x32xf32>
    %cst_32 = arith.constant 9.99999974E-6 : f32
    %110 = vector.broadcast %cst_32 : f32 to vector<32x1xf32>
    %111 = arith.addf %107, %110 : vector<32x1xf32>
    %112 = math.rsqrt %111 : vector<32x1xf32>
    %113 = vector.broadcast %112 : vector<32x1xf32> to vector<32x32xf32>
    %114 = arith.mulf %109, %113 : vector<32x32xf32>
    %115 = vector.broadcast %9 : vector<1x32xf32> to vector<32x32xf32>
    %116 = arith.mulf %114, %115 : vector<32x32xf32>
    %117 = vector.broadcast %10 : vector<1x32xf32> to vector<32x32xf32>
    %118 = arith.addf %116, %117 : vector<32x32xf32>
    %119 = arith.truncf %118 : vector<32x32xf32> to vector<32x32xbf16>
    %c0_33 = arith.constant 0 : index
    %c0_34 = arith.constant 0 : index
    %c0_35 = arith.constant 0 : index
    %120 = vector.load %arg11[%c0_33, %c0_34, %c0_35] : memref<1x32x128xbf16, #tpu.memory_space<vmem>>, vector<1x32x128xbf16>
    %121 = vector.shape_cast %120 : vector<1x32x128xbf16> to vector<32x128xbf16>
    %cst_36 = arith.constant dense<0.000000e+00> : vector<32x128xf32>
    %122 = tpu.matmul %119, %121, %cst_36 {dimension_numbers = #tpu.dot_dimension_numbers<[1], [0], [0], [1], [0, 0, 1, 1], [], []>} : vector<32x32xbf16>, vector<32x128xbf16>, vector<32x128xf32> -> vector<32x128xf32>
    %c0_37 = arith.constant 0 : index
    %c0_38 = arith.constant 0 : index
    %c0_39 = arith.constant 0 : index
    %123 = vector.load %arg12[%c0_37, %c0_38, %c0_39] : memref<1x1x128xf32, #tpu.memory_space<vmem>>, vector<1x1x128xf32>
    %124 = vector.shape_cast %123 : vector<1x1x128xf32> to vector<1x128xf32>
    %125 = vector.broadcast %124 : vector<1x128xf32> to vector<32x128xf32>
    %126 = arith.addf %122, %125 : vector<32x128xf32>
    %cst_40 = arith.constant 1.702000e+00 : f32
    %127 = vector.broadcast %cst_40 : f32 to vector<32x128xf32>
    %128 = arith.mulf %127, %126 : vector<32x128xf32>
    %129 = arith.negf %128 : vector<32x128xf32>
    %130 = math.exp %129 : vector<32x128xf32>
    %cst_41 = arith.constant 1.000000e+00 : f32
    %131 = vector.broadcast %cst_41 : f32 to vector<32x128xf32>
    %132 = arith.addf %131, %130 : vector<32x128xf32>
    %133 = arith.divf %131, %132 : vector<32x128xf32>
    %134 = arith.mulf %126, %133 : vector<32x128xf32>
    %135 = arith.truncf %134 : vector<32x128xf32> to vector<32x128xbf16>
    %c0_42 = arith.constant 0 : index
    %c0_43 = arith.constant 0 : index
    %c0_44 = arith.constant 0 : index
    %136 = vector.load %arg13[%c0_42, %c0_43, %c0_44] : memref<1x128x32xbf16, #tpu.memory_space<vmem>>, vector<1x128x32xbf16>
    %137 = vector.shape_cast %136 : vector<1x128x32xbf16> to vector<128x32xbf16>
    %cst_45 = arith.constant dense<0.000000e+00> : vector<32x32xf32>
    %138 = tpu.matmul %135, %137, %cst_45 {dimension_numbers = #tpu.dot_dimension_numbers<[1], [0], [0], [1], [0, 0, 1, 1], [], []>} : vector<32x128xbf16>, vector<128x32xbf16>, vector<32x32xf32> -> vector<32x32xf32>
    %139 = vector.broadcast %11 : vector<1x32xf32> to vector<32x32xf32>
    %140 = arith.addf %138, %139 : vector<32x32xf32>
    %141 = arith.addf %96, %140 : vector<32x32xf32>
    %c0_46 = arith.constant 0 : index
    %c0_47 = arith.constant 0 : index
    %142 = vector.load %arg18[%c0_46, %c0_47] : memref<32x32xf32, #tpu.memory_space<vmem>>, vector<32x32xf32>
    tpu.vector_store %arg18[%c0_46, %c0_47], %141 {strides = array<i32>} : memref<32x32xf32, #tpu.memory_space<vmem>>, vector<32x32xf32>,
    %c1_i32 = arith.constant 1 : i32
    %143 = arith.cmpi eq, %arg1, %c1_i32 : i32
    %144 = arith.extui %143 : i1 to i32
    %c0_i32_48 = arith.constant 0 : i32
    %145 = arith.cmpi ne, %144, %c0_i32_48 : i32
    scf.if %145 {
      %c0_49 = arith.constant 0 : index
      %c0_50 = arith.constant 0 : index
      %146 = vector.load %arg14[%c0_49, %c0_50] : memref<1x32xf32, #tpu.memory_space<vmem>>, vector<1x32xf32>
      %c0_51 = arith.constant 0 : index
      %c0_52 = arith.constant 0 : index
      %147 = vector.load %arg15[%c0_51, %c0_52] : memref<1x32xf32, #tpu.memory_space<vmem>>, vector<1x32xf32>
      %cst_53 = arith.constant dense<0.000000e+00> : vector<32xf32>
      %148 = vector.multi_reduction <add>, %141, %cst_53 [1] : vector<32x32xf32> to vector<32xf32>
      %149 = vector.shape_cast %148 : vector<32xf32> to vector<32x1xf32>
      %cst_54 = arith.constant 3.200000e+01 : f32
      %150 = vector.broadcast %cst_54 : f32 to vector<32x1xf32>
      %151 = arith.divf %149, %150 : vector<32x1xf32>
      %152 = vector.broadcast %151 : vector<32x1xf32> to vector<32x32xf32>
      %153 = arith.subf %141, %152 : vector<32x32xf32>
      %154 = arith.mulf %153, %153 : vector<32x32xf32>
      %cst_55 = arith.constant dense<0.000000e+00> : vector<32xf32>
      %155 = vector.multi_reduction <add>, %154, %cst_55 [1] : vector<32x32xf32> to vector<32xf32>
      %156 = vector.shape_cast %155 : vector<32xf32> to vector<32x1xf32>
      %cst_56 = arith.constant 3.200000e+01 : f32
      %157 = vector.broadcast %cst_56 : f32 to vector<32x1xf32>
      %158 = arith.divf %156, %157 : vector<32x1xf32>
      %159 = vector.broadcast %151 : vector<32x1xf32> to vector<32x32xf32>
      %160 = arith.subf %141, %159 : vector<32x32xf32>
      %cst_57 = arith.constant 9.99999974E-6 : f32
      %161 = vector.broadcast %cst_57 : f32 to vector<32x1xf32>
      %162 = arith.addf %158, %161 : vector<32x1xf32>
      %163 = math.rsqrt %162 : vector<32x1xf32>
      %164 = vector.broadcast %163 : vector<32x1xf32> to vector<32x32xf32>
      %165 = arith.mulf %160, %164 : vector<32x32xf32>
      %166 = vector.broadcast %146 : vector<1x32xf32> to vector<32x32xf32>
      %167 = arith.mulf %165, %166 : vector<32x32xf32>
      %168 = vector.broadcast %147 : vector<1x32xf32> to vector<32x32xf32>
      %169 = arith.addf %167, %168 : vector<32x32xf32>
      %170 = arith.truncf %169 : vector<32x32xf32> to vector<32x32xbf16>
      %c0_58 = arith.constant 0 : index
      %c0_59 = arith.constant 0 : index
      %171 = vector.load %arg16[%c0_58, %c0_59] : memref<32x128xbf16, #tpu.memory_space<vmem>>, vector<32x128xbf16>
      %cst_60 = arith.constant dense<0.000000e+00> : vector<32x128xf32>
      %172 = tpu.matmul %170, %171, %cst_60 {dimension_numbers = #tpu.dot_dimension_numbers<[1], [0], [0], [1], [0, 0, 1, 1], [], []>} : vector<32x32xbf16>, vector<32x128xbf16>, vector<32x128xf32> -> vector<32x128xf32>
      %c0_61 = arith.constant 0 : index
      %c0_62 = arith.constant 0 : index
      %c0_63 = arith.constant 0 : index
      %173 = vector.load %arg17[%c0_61, %c0_62, %c0_63] : memref<1x32x128xf32, #tpu.memory_space<vmem>>, vector<1x32x128xf32>
      %174 = vector.shape_cast %173 : vector<1x32x128xf32> to vector<32x128xf32>
      %175 = vector.shape_cast %172 : vector<32x128xf32> to vector<1x32x128xf32>
      tpu.vector_store %arg17[%c0_61, %c0_62, %c0_63], %175 {strides = array<i32>} : memref<1x32x128xf32, #tpu.memory_space<vmem>>, vector<1x32x128xf32>,
    } else {
    }
    return
  }
  func.func @transform_0(%arg0: i32, %arg1: i32) -> (i32, i32, i32) {
    %c0_i32 = arith.constant 0 : i32
    %c0_i32_0 = arith.constant 0 : i32
    %c0_i32_1 = arith.constant 0 : i32
    return %arg0, %c0_i32, %c0_i32_0 : i32, i32, i32
  }
  func.func @transform_1(%arg0: i32, %arg1: i32) -> (i32, i32) {
    %c0_i32 = arith.constant 0 : i32
    %c0_i32_0 = arith.constant 0 : i32
    %c0_i32_1 = arith.constant 0 : i32
    return %c0_i32, %c0_i32_0 : i32, i32
  }
  func.func @transform_2(%arg0: i32, %arg1: i32) -> (i32, i32) {
    %c0_i32 = arith.constant 0 : i32
    %c0_i32_0 = arith.constant 0 : i32
    %c0_i32_1 = arith.constant 0 : i32
    return %c0_i32, %c0_i32_0 : i32, i32
  }
  func.func @transform_3(%arg0: i32, %arg1: i32) -> (i32, i32) {
    %c0_i32 = arith.constant 0 : i32
    %c0_i32_0 = arith.constant 0 : i32
    %c0_i32_1 = arith.constant 0 : i32
    return %c0_i32, %c0_i32_0 : i32, i32
  }
  func.func @transform_4(%arg0: i32, %arg1: i32) -> (i32, i32) {
    %c0_i32 = arith.constant 0 : i32
    %c0_i32_0 = arith.constant 0 : i32
    %c0_i32_1 = arith.constant 0 : i32
    return %c0_i32, %c0_i32_0 : i32, i32
  }
  func.func @transform_5(%arg0: i32, %arg1: i32) -> (i32, i32, i32) {
    %c0_i32 = arith.constant 0 : i32
    %c0_i32_0 = arith.constant 0 : i32
    %c0_i32_1 = arith.constant 0 : i32
    return %arg1, %c0_i32, %c0_i32_0 : i32, i32, i32
  }
  func.func @transform_6(%arg0: i32, %arg1: i32) -> (i32, i32, i32) {
    %c0_i32 = arith.constant 0 : i32
    %c0_i32_0 = arith.constant 0 : i32
    %c0_i32_1 = arith.constant 0 : i32
    return %arg1, %c0_i32, %c0_i32_0 : i32, i32, i32
  }
  func.func @transform_7(%arg0: i32, %arg1: i32) -> (i32, i32, i32) {
    %c0_i32 = arith.constant 0 : i32
    %c0_i32_0 = arith.constant 0 : i32
    %c0_i32_1 = arith.constant 0 : i32
    return %arg1, %c0_i32, %c0_i32_0 : i32, i32, i32
  }
  func.func @transform_8(%arg0: i32, %arg1: i32) -> (i32, i32, i32) {
    %c0_i32 = arith.constant 0 : i32
    %c0_i32_0 = arith.constant 0 : i32
    %c0_i32_1 = arith.constant 0 : i32
    return %arg1, %c0_i32, %c0_i32_0 : i32, i32, i32
  }
  func.func @transform_9(%arg0: i32, %arg1: i32) -> (i32, i32, i32) {
    %c0_i32 = arith.constant 0 : i32
    %c0_i32_0 = arith.constant 0 : i32
    %c0_i32_1 = arith.constant 0 : i32
    return %arg1, %c0_i32, %c0_i32_0 : i32, i32, i32
  }
  func.func @transform_10(%arg0: i32, %arg1: i32) -> (i32, i32, i32) {
    %c0_i32 = arith.constant 0 : i32
    %c0_i32_0 = arith.constant 0 : i32
    %c0_i32_1 = arith.constant 0 : i32
    return %arg1, %c0_i32, %c0_i32_0 : i32, i32, i32
  }
  func.func @transform_11(%arg0: i32, %arg1: i32) -> (i32, i32, i32) {
    %c0_i32 = arith.constant 0 : i32
    %c0_i32_0 = arith.constant 0 : i32
    %c0_i32_1 = arith.constant 0 : i32
    return %arg1, %c0_i32, %c0_i32_0 : i32, i32, i32
  }
  func.func @transform_12(%arg0: i32, %arg1: i32) -> (i32, i32) {
    %c0_i32 = arith.constant 0 : i32
    %c0_i32_0 = arith.constant 0 : i32
    %c0_i32_1 = arith.constant 0 : i32
    return %c0_i32, %c0_i32_0 : i32, i32
  }
  func.func @transform_13(%arg0: i32, %arg1: i32) -> (i32, i32) {
    %c0_i32 = arith.constant 0 : i32
    %c0_i32_0 = arith.constant 0 : i32
    %c0_i32_1 = arith.constant 0 : i32
    return %c0_i32, %c0_i32_0 : i32, i32
  }
  func.func @transform_14(%arg0: i32, %arg1: i32) -> (i32, i32) {
    %c0_i32 = arith.constant 0 : i32
    %c0_i32_0 = arith.constant 0 : i32
    %c0_i32_1 = arith.constant 0 : i32
    return %c0_i32, %c0_i32_0 : i32, i32
  }
  func.func @transform_15(%arg0: i32, %arg1: i32) -> (i32, i32, i32) {
    %c0_i32 = arith.constant 0 : i32
    %c0_i32_0 = arith.constant 0 : i32
    %c0_i32_1 = arith.constant 0 : i32
    return %arg0, %c0_i32, %c0_i32_0 : i32, i32, i32
  }
}

</mosaic_0001>

<bundles_post_ra>
// kernel: tpu_custom_call.1
= control target key start
LH: loop header
LB: loop body
LE: loop exit
PB: predicated region body
PF: predicated region fallthrough
CT: control target
= control target key end

     0   :  { %s3104_s0 = inlined_call_operand.vmem [shape: bf16[2,32,128], index: 0, kind: input, shape index: {}]   ;;  %s3105_s1 = inlined_call_operand.vmem [shape: bf16[128,32], index: 1, kind: input, shape index: {}]   ;;  %s3106_s2 = inlined_call_operand.vmem [shape: f32[16,32], index: 2, kind: input, shape index: {}]   ;;  %s3107_s3 = inlined_call_operand.vmem [shape: f32[1,32], index: 3, kind: input, shape index: {}]   ;;  %s3108_s4 = inlined_call_operand.vmem [shape: f32[1,32], index: 4, kind: input, shape index: {}]   ;;  %s3109_s5 = inlined_call_operand.vmem [shape: bf16[2,32,96], index: 5, kind: input, shape index: {}]   ;;  %s3110_s6 = inlined_call_operand.vmem [shape: f32[2,1,96], index: 6, kind: input, shape index: {}]   ;;  %s3111_s7 = inlined_call_operand.vmem [shape: bf16[2,32,32], index: 7, kind: input, shape index: {}]   ;;  %s3112_s8 = inlined_call_operand.vmem [shape: f32[2,6,32], index: 8, kind: input, shape index: {}]   ;;  %s3113_s9 = inlined_call_operand.vmem [shape: bf16[2,32,128], index: 9, kind: input, shape index: {}]   ;;  %s3114_s10 = inlined_call_operand.vmem [shape: f32[2,1,128], index: 10, kind: input, shape index: {}]   ;;  %s3115_s11 = inlined_call_operand.vmem [shape: bf16[2,128,32], index: 11, kind: input, shape index: {}]   ;;  %s3116_s12 = inlined_call_operand.vmem [shape: f32[1,32], index: 12, kind: input, shape index: {}]   ;;  %s3117_s13 = inlined_call_operand.vmem [shape: f32[1,32], index: 13, kind: input, shape index: {}]   ;;  %s3118_s14 = inlined_call_operand.vmem [shape: bf16[32,128], index: 14, kind: input, shape index: {}]   ;;  %s3119_s15 = inlined_call_operand.hbm [shape: f32[2,32,128], index: 15, kind: output, shape index: {}]  }
   0x1   :  { %3135 = sst [smem:[#allocation18_spill]] %s3104_s0 }
   0x2   :  { %3136 = sst [smem:[#allocation19_spill]] %s3109_s5 }
   0x3   :  { %3137 = sst [smem:[#allocation20_spill]] %s3111_s7 }
   0x4   :  { %3138 = sst [smem:[#allocation21_spill]] %s3116_s12 }
   0x5   :  { %3139 = sst [smem:[#allocation22_spill]] %s3117_s13 }
   0x6   :  { %3140 = sst [smem:[#allocation23_spill]] %s3118_s14 }
   0x7   :  { %3141 = sst [smem:[#allocation24_spill]] %s3119_s15 }
   0x8   :  { %20 = vsyncpa [#allocation4], 0 }
   0x9   :  { %22 = vsyncpa [#allocation4 + $0x1], 0  ;;  %s2596_s18 = smov 0   ;;  %s2598_s19 = smov 0  }
   0xa   :  { %s2600_s20 = smov 0   ;;  %s2602_s21 = smov 0  }
   0xb   :  { %s2604_s22 = smov 0   ;;  %s2606_s23 = smov 0  }
   0xc   :  { %s2608_s24 = smov 0   ;;  %s2610_s25 = smov 0  }
   0xd LB: > { %3142 = sst [smem:[#allocation6_spill]] %s2476_s18  ;;  %s2048_s26 = sadd.s32 4294967295, %s2504_s25   ;;  %s2504_s25 = sphi %s2610_s25, %s28_s25   ;;  %s2500_s24 = sphi %s2608_s24, %s3177_s24   ;;  %s2496_s23 = sphi %s2606_s23, %s3176_s23   ;;  %s2492_s22 = sphi %s2604_s22, %s3175_s22   ;;  %s2488_s21 = sphi %s2602_s21, %s3174_s21   ;;  %s2484_s20 = sphi %s2600_s20, %s3173_s20   ;;  %s2480_s19 = sphi %s2598_s19, %s3172_s19   ;;  %s2476_s18 = sphi %s2596_s18, %s3171_s18  }
   0xe   : > { %3143 = sst [smem:[#allocation7_spill]] %s2480_s19  ;;  %s2049_s27 = sadd.s32 4294967294, %s2504_s25  }
   0xf   : > { %3144 = sst [smem:[#allocation8_spill]] %s2484_s20  ;;  %s37_s28 = sadd.s32 1, %s2496_s23 }
  0x10   : > { %3145 = sst [smem:[#allocation9_spill]] %s2492_s22  ;;  %p38_p0 = scmp.ge.s32.totalorder %s37_s28, 2 }
  0x11   : > { %3146 = sst [smem:[#allocation10_spill]] %s2496_s23  ;;  %s40_s29 = sadd.s32 1, %s2500_s24 }
  0x12   : > { %3147 = sst [smem:[#allocation11_spill]] %s2500_s24  ;;  %p412_p1 = scmp.ne.s32.totalorder %s2484_s20, %s2480_s19 }
  0x13   : > { %3148 = sst [smem:[#allocation12_spill]] %s2504_s25  ;;  %p413_p2 = scmp.eq.s32.totalorder %s2048_s26, 3 }
  0x14   : > { %s3179_s28 = smov (%p38_p0, %s37_s28), 0  ;;  %s3181_s29 = smov (!%p38_p0, %s40_s29), %s2500_s24 }
  0x15   : > { %3149 = sst [smem:[#allocation13_spill]] %s3179_s28  ;;  %p2645_p3 = por %p413_p2, %p412_p1 }
  0x16   : > { %p418_p4 = scmp.ne.s32.totalorder %s2480_s19, %s2476_s18  ;;  %p42_p5 = scmp.ge.s32.totalorder %s3181_s29, 2 }
  0x17   : > { %s3150_s30 = scalar_select %p2645_p3, 1, 0 }
  0x18   : > { %p419_p6 = scmp.eq.s32.totalorder %s2049_s27, 3  ;;  %p2052_p7 = scmp.ge.s32.totalorder %s2504_s25, 1 }
  0x19   : > { %3151 = sst [smem:[#allocation14_spill]] %s3150_s30  ;;  %p517_p8 = scmp.lt.s32.totalorder %s2504_s25, 5 }
  0x1a   : > { %s3183_s29 = smov (%p42_p5, %s3181_s29), 0  ;;  %p2655_p9 = por %p419_p6, %p418_p4 }
  0x1b   : > { %3152 = sst [smem:[#allocation15_spill]] %s3183_s29  ;;  %p518_p10 = pnand %p2052_p7, %p517_p8 }
  0x1c   : > { %s3153_s16 = scalar_select %p2655_p9, 1, 0 }
  0x1d   : > { %s399_s17 = ssub.s32 %s2500_s24, %s3183_s29  ;;  %s402_s26 = sadd.s32 1, %s2484_s20 }
  0x1e   : > { %3154 = sst [smem:[#allocation16_spill]] %s3153_s16  ;;  %p400_p11 = scmp.eq.s32.totalorder %s399_s17, 0 }
  0x1f   : > { %521 = sbr.rel (%p518_p10) target bundleno = 2885 (0xb45), region = 80  ;;  %s3128_s27 = sand.u32 (!%p518_p10), 1, %s2480_s19  }
  0x20   : > { %s2663_s28 = scalar_select %p400_p11, %s2484_s20, %s402_s26  }
  0x21   : > { %p595_p12 = scmp.lt.s32.totalorder (!%p518_p10), %s2492_s22, 1  ;;  %s2053_s23 = sshll.u32 (!%p518_p10), %s3128_s27, 5 }
  0x22   : > { %3155 = sst [smem:[#allocation17_spill]] %s2663_s28  ;;  %p600_p13 = scmp.lt.s32.totalorder (!%p518_p10), %s2488_s21, 1 }
  0x23   : > { %s3156_s0 = sld [smem:[#allocation18_spill]] (!%p518_p10)  ;;  %p2065_p0 = scmp.ne.s32.totalorder (!%p518_p10), %s2488_s21, 0 }
  0x24   : > { %s596_s18 = scalar_select %p595_p12, %s2492_s22, 1 }
  0x25   : > { %s2672_s16 = scalar_select %p600_p13, %s2488_s21, 1 }
  0x26   : > { %s2196_s17 = sshll.u32 %s596_s18, 4  ;;  %s3157_s5 = sld [smem:[#allocation19_spill]] }
  0x27   : > { %s2197_s28 = sshll.u32 %s2672_s16, 4  ;;  %s3158_s7 = sld [smem:[#allocation20_spill]] }
  0x28   : > { %s2060_s18 = sshll.u32 %s2672_s16, 3  ;;  %s2703_s20 = scalar_lea.vmem %s3113_s9, %s2197_s28 }
  0x29   : > { %s2677_s24 = scalar_lea.vmem %s3156_s0, %s2196_s17  ;;  %s2698_s17 = scalar_lea.vmem %s3112_s8, %s2060_s18 }
  0x2a   : > { %s624_s15 = scalar_lea.vmem %s3114_s10, %s2672_s16  ;;  %s2200_s30 = sshll.u32 %s2672_s16, 6 }
  0x2b   : > { %s2713_s22 = scalar_lea.vmem %s3115_s11, %s2200_s30  ;;  %634 = sbr.rel (%p2065_p0) target bundleno = 486 (0x1e6), region = 84 }
  0x2c   : > { %s2683_s27 = scalar_lea.vmem %s3157_s5, %s2197_s28 }
  0x2d   : > { %s2692_s12 = scalar_lea.vmem %s3158_s7, %s2197_s28  ;;  %s2715_s7 = scalar_lea.vmem [#allocation3], %s2053_s23 }
  0x30   : > { %v2210_v0 = vld [vmem:[%s3105_s1 + $0x38] sm:$0xff]  ;;  %v2209_v1 = vld [vmem:[%s3105_s1 + $0x30] sm:$0xff]  ;;  %v2208_v2 = vld [vmem:[%s3105_s1 + $0x28] sm:$0xff]  ;;  %vm742_vm0 = vcmask 261120   ;;  %v2506_v24 = vmov 32.0  }
  0x31   : > { %715 = vmatpush.bf16.msra.mxu0 %v2210_v0  ;;  %2228 = vmatpush.bf16.msra.mxu1 %v2210_v0  ;;  %v2207_v3 = vld [vmem:[%s3105_s1 + $0x20] sm:$0xff]  ;;  %v2206_v4 = vld [vmem:[%s3105_s1 + $0x18] sm:$0xff]  ;;  %v2205_v5 = vld [vmem:[%s3105_s1 + $0x10] sm:$0xff]  ;;  %2321 = vrcp.f32 %v2506_v24 }
  0x32   : > { %v2204_v6 = vld [vmem:[%s3105_s1 + $0x8] sm:$0xff]  ;;  %v2203_v7 = vld [vmem:[%s3105_s1] sm:$0xff] }
  0x33   : > { %v2201_v8 = vld [vmem:[%s2677_s24] sm:$0xff]  ;;  %v2202_v9 = vld [vmem:[%s2677_s24 + $0x8] sm:$0xff] }
  0x34   : > { %v734_v10 = vld [vmem:[%s3106_s2] sm:$0xff]  ;;  %v735_v17 = vld [vmem:[%s3106_s2 + $0x8] sm:$0xff] }
  0x35   : > { %716 = vmatpush.bf16.msra.mxu0 %v2209_v1  ;;  %2229 = vmatpush.bf16.msra.mxu1 %v2209_v1 }
  0x37   : > { %v2322_v25 = vpop.eup %2321 }
  0x38   : > { %v756_v26 = vmul.f32 32.0, %v2322_v25  ;;  %vm760_vm1 = vweird.f32 %v2322_v25 }
  0x39   : > { %717 = vmatpush.bf16.msra.mxu0 %v2208_v2  ;;  %2230 = vmatpush.bf16.msra.mxu1 %v2208_v2 }
  0x3a   : > { %v757_v27 = vsub.f32 1.0, %v756_v26 }
  0x3c   : > { %v758_v28 = vmul.f32 %v2322_v25, %v757_v27 }
  0x3d   : > { %718 = vmatpush.bf16.msra.mxu0 %v2207_v3  ;;  %2231 = vmatpush.bf16.msra.mxu1 %v2207_v3 }
  0x3e   : > { %v759_v29 = vadd.f32 %v2322_v25, %v758_v28 }
  0x40   : > { %v761_v30 = vsel %vm760_vm1, %v2322_v25, %v759_v29 }
  0x41   : > { %719 = vmatpush.bf16.msra.mxu0 %v2206_v4  ;;  %2232 = vmatpush.bf16.msra.mxu1 %v2206_v4 }
  0x45   : > { %720 = vmatpush.bf16.msra.mxu0 %v2205_v5  ;;  %2233 = vmatpush.bf16.msra.mxu1 %v2205_v5 }
  0x49   : > { %721 = vmatpush.bf16.msra.mxu0 %v2204_v6  ;;  %2234 = vmatpush.bf16.msra.mxu1 %v2204_v6 }
  0x4d   : > { %722 = vmatpush.bf16.msra.mxu0 %v2203_v7  ;;  %2235 = vmatpush.bf16.msra.mxu1 %v2203_v7 }
  0x50   : > { %723 = vmatmul.bf16.vlgmr.msra.gmra.mxu0 %v2201_v8  ;;  %728 = vmatmul.bf16.vlgmr.msra.gmra.mxu1 %v2202_v9 }
  0xcd   : > { %v724_v11 = vpop.f32.mrf.mxu0  ;;  %v729_v12 = vpop.f32.mrf.mxu1 }
  0xce   : > { %v736_v13 = vadd.f32 %v734_v10, %v724_v11  ;;  %v738_v14 = vadd.f32 %v734_v10, %v729_v12 }
  0xd0   : > { %v749_v15 = vsel %vm742_vm0, %v738_v14, 0.0  ;;  %v743_v16 = vsel %vm742_vm0, %v736_v13, 0.0 }
  0xd1   : > { %750 = vadd.xlane.f32.xlu1 %v749_v15  ;;  %744 = vadd.xlane.f32.xlu0 %v743_v16 }
  0xd5   : > { %v726_v18 = vpop.f32.mrf.mxu0  ;;  %v731_v19 = vpop.f32.mrf.mxu1 }
  0xd6   : > { %v737_v20 = vadd.f32 %v735_v17, %v726_v18  ;;  %v739_v21 = vadd.f32 %v735_v17, %v731_v19  ;;  %v2320_v18 = vld [vmem:[%s3108_s4] ss:$0 sm:$0xff] }
  0xd8   : > { %v752_v22 = vsel %vm742_vm0, %v739_v21, 0.0  ;;  %v746_v23 = vsel %vm742_vm0, %v737_v20, 0.0 }
  0xd9   : > { %753 = vadd.xlane.f32.xlu1 %v752_v22  ;;  %747 = vadd.xlane.f32.xlu0 %v746_v23 }
 0x144   : > { %v751_v31 = vpop.xlane.xlu1 %750  ;;  %v745_v32 = vpop.xlane.xlu0 %744 }
 0x145   : > { %v764_v33 = vmul.f32 %v761_v30, %v751_v31  ;;  %v762_v34 = vmul.f32 %v761_v30, %v745_v32 }
 0x147   : > { %v2754_v35 = vsub.f32 %v738_v14, %v764_v33  ;;  %v766_v36 = vsub.f32 %v736_v13, %v762_v34  ;;  %v2319_v13 = vld [vmem:[%s3107_s3] ss:$0 sm:$0xff] }
 0x149   : > { %v770_v37 = vmul.f32 %v766_v36, %v766_v36  ;;  %v772_v38 = vmul.f32 %v2754_v35, %v2754_v35 }
 0x14b   : > { %v774_v39 = vsel %vm742_vm0, %v770_v37, 0.0  ;;  %v780_v40 = vsel %vm742_vm0, %v772_v38, 0.0 }
 0x14c   : > { %v754_v41 = vpop.xlane.xlu1 %753  ;;  %775 = vadd.xlane.f32.xlu2 %v774_v39  ;;  %781 = vadd.xlane.f32.xlu0 %v780_v40  ;;  %v748_v42 = vpop.xlane.xlu0 %747 }
 0x14d   : > { %v765_v43 = vmul.f32 %v761_v30, %v754_v41  ;;  %v763_v44 = vmul.f32 %v761_v30, %v748_v42 }
 0x14f   : > { %v2760_v45 = vsub.f32 %v739_v21, %v765_v43  ;;  %v2762_v46 = vsub.f32 %v737_v20, %v763_v44 }
 0x151   : > { %v773_v47 = vmul.f32 %v2760_v45, %v2760_v45  ;;  %v771_v48 = vmul.f32 %v2762_v46, %v2762_v46 }
 0x153   : > { %v783_v49 = vsel %vm742_vm0, %v773_v47, 0.0  ;;  %v777_v50 = vsel %vm742_vm0, %v771_v48, 0.0 }
 0x154   : > { %784 = vadd.xlane.f32.xlu1 %v783_v49  ;;  %778 = vadd.xlane.f32.xlu2 %v777_v50 }
 0x1bf   : > { %v776_v51 = vpop.xlane.xlu2 %775  ;;  %v782_v52 = vpop.xlane.xlu0 %781 }
 0x1c0   : > { %v786_v53 = vmul.f32 %v776_v51, %v761_v30  ;;  %v788_v54 = vmul.f32 %v782_v52, %v761_v30 }
 0x1c2   : > { %v790_v55 = vadd.f32 1e-05, %v786_v53  ;;  %v792_v56 = vadd.f32 1e-05, %v788_v54 }
 0x1c4   : > { %2323 = vrsqrt.f32 %v790_v55  ;;  %vm800_vm4 = vweird.f32 %v790_v55  ;;  %vm820_vm6 = vweird.f32 %v792_v56 }
 0x1c5   : > { %2325 = vrsqrt.f32 %v792_v56 }
 0x1c7   : > { %v785_v57 = vpop.xlane.xlu1 %784  ;;  %v779_v58 = vpop.xlane.xlu2 %778 }
 0x1c8   : > { %v789_v59 = vmul.f32 %v785_v57, %v761_v30  ;;  %v787_v60 = vmul.f32 %v779_v58, %v761_v30 }
 0x1ca   : > { %v2324_v61 = vpop.eup %2323  ;;  %v793_v62 = vadd.f32 1e-05, %v789_v59  ;;  %v791_v63 = vadd.f32 1e-05, %v787_v60 }
 0x1cb   : > { %v2326_v0 = vpop.eup %2325  ;;  %v795_v1 = vmul.f32 %v2324_v61, %v790_v55  ;;  %vm801_vm2 = vweird.f32 %v2324_v61 }
 0x1cc   : > { %v815_v2 = vmul.f32 %v2326_v0, %v792_v56  ;;  %2327 = vrsqrt.f32 %v793_v62  ;;  %vm821_vm3 = vweird.f32 %v2326_v0  ;;  %vm802_vm5 = vmor %vm800_vm4, %vm801_vm2  ;;  %vm830_vm10 = vweird.f32 %v793_v62 }
 0x1cd   : > { %v796_v3 = vmul.f32 %v2324_v61, %v795_v1  ;;  %2329 = vrsqrt.f32 %v791_v63  ;;  %vm822_vm7 = vmor %vm820_vm6, %vm821_vm3  ;;  %vm810_vm12 = vweird.f32 %v791_v63 }
 0x1ce   : > { %v816_v4 = vmul.f32 %v2326_v0, %v815_v2 }
 0x1cf   : > { %v797_v5 = vmul.f32 0.5, %v796_v3 }
 0x1d0   : > { %v817_v6 = vmul.f32 0.5, %v816_v4 }
 0x1d1   : > { %v798_v7 = vsub.f32 1.5, %v797_v5 }
 0x1d2   : > { %v2328_v8 = vpop.eup %2327  ;;  %v818_v9 = vsub.f32 1.5, %v817_v6 }
 0x1d3   : > { %v2330_v10 = vpop.eup %2329  ;;  %v799_v11 = vmul.f32 %v2324_v61, %v798_v7  ;;  %v825_v12 = vmul.f32 %v2328_v8, %v793_v62  ;;  %vm831_vm8 = vweird.f32 %v2328_v8 }
 0x1d4   : > { %v819_v14 = vmul.f32 %v2326_v0, %v818_v9  ;;  %v805_v15 = vmul.f32 %v2330_v10, %v791_v63  ;;  %vm811_vm9 = vweird.f32 %v2330_v10  ;;  %vm832_vm11 = vmor %vm830_vm10, %vm831_vm8 }
 0x1d5   : > { %v803_v16 = vsel %vm802_vm5, %v2324_v61, %v799_v11  ;;  %v826_v17 = vmul.f32 %v2328_v8, %v825_v12  ;;  %vm812_vm13 = vmor %vm810_vm12, %vm811_vm9 }
 0x1d6   : > { %v834_v19 = vmul.f32 %v803_v16, %v766_v36  ;;  %v823_v20 = vsel %vm822_vm7, %v2326_v0, %v819_v14  ;;  %v806_v21 = vmul.f32 %v2330_v10, %v805_v15 }
 0x1d7   : > { %v836_v22 = vmul.f32 %v823_v20, %v2754_v35  ;;  %v827_v23 = vmul.f32 0.5, %v826_v17 }
 0x1d8   : > { %v841_v24 = vmul.f32 %v2319_v13, %v834_v19  ;;  %v807_v25 = vmul.f32 0.5, %v806_v21 }
 0x1d9   : > { %v843_v26 = vmul.f32 %v2319_v13, %v836_v22  ;;  %v828_v27 = vsub.f32 1.5, %v827_v23 }
 0x1da   : > { %v848_v28 = vadd.f32 %v2320_v18, %v841_v24  ;;  %v808_v29 = vsub.f32 1.5, %v807_v25 }
 0x1db   : > { %v850_v30 = vadd.f32 %v2320_v18, %v843_v26  ;;  %v829_v31 = vmul.f32 %v2328_v8, %v828_v27 }
 0x1dc   : > { %852 = vst.msk [vmem:[#allocation2] sm:$0xff] %vm742_vm0, %v848_v28  ;;  %v809_v32 = vmul.f32 %v2330_v10, %v808_v29 }
 0x1dd   : > { %854 = vst.msk [vmem:[#allocation2 + $0x10] sm:$0xff] %vm742_vm0, %v850_v30  ;;  %v833_v33 = vsel %vm832_vm11, %v2328_v8, %v829_v31 }
 0x1de   : > { %v837_v34 = vmul.f32 %v833_v33, %v2760_v45  ;;  %v813_v35 = vsel %vm812_vm13, %v2330_v10, %v809_v32 }
 0x1df   : > { %v835_v36 = vmul.f32 %v813_v35, %v2762_v46 }
 0x1e0   : > { %v844_v37 = vmul.f32 %v2319_v13, %v837_v34 }
 0x1e1   : > { %v842_v38 = vmul.f32 %v2319_v13, %v835_v36 }
 0x1e2   : > { %v851_v39 = vadd.f32 %v2320_v18, %v844_v37 }
 0x1e3   : > { %v849_v40 = vadd.f32 %v2320_v18, %v842_v38 }
 0x1e4   : > { %855 = vst.msk [vmem:[#allocation2 + $0x18] sm:$0xff] %vm742_vm0, %v851_v39 }
 0x1e5   : > { %853 = vst.msk [vmem:[#allocation2 + $0x8] sm:$0xff] %vm742_vm0, %v849_v40 }
 0x1e6 PF: > { %v2783_v41 = vld [vmem:[#allocation2 + $0x10] sm:$0xff]  ;;  %vm861_vm14 = vcmask 261120   ;;  %v2785_v42 = vld [vmem:[#allocation2] sm:$0xff]  ;;  %v2507_v49 = vmov 32.0   ;;  %v2212_v12 = vld [vmem:[%s2683_s27 + $0x8] sm:$0xff]  ;;  %s3159_s14 = scalar_lea.vmem %s3110_s6, %s2672_s16  ;;  %s2508_s18 = smov 80  }
 0x1e7   : > { %v868_v43 = vsel %vm861_vm14, %v2783_v41, 0.0  ;;  %v862_v44 = vsel %vm861_vm14, %v2785_v42, 0.0  ;;  %2333 = vrcp.f32 %v2507_v49  ;;  %1001 = vmatpush.bf16.msra.mxu0 %v2212_v12  ;;  %v2211_v16 = vld [vmem:[%s2683_s27] sm:$0xff]  ;;  %s2509_s0 = smov 96   ;;  %s2510_s5 = smov 112   ;;  %vm1025_vm12 = vcmask 130048  }
 0x1e8   : > { %869 = vadd.xlane.f32.xlu1 %v868_v43  ;;  %863 = vadd.xlane.f32.xlu0 %v862_v44  ;;  %s2511_s19 = smov 64   ;;  %s2512_s28 = smov 48  }
 0x1e9   : > { %s2513_s24 = smov 16   ;;  %p2180_p1 = scmp.ne.s32.totalorder %s2488_s21, 1 }
 0x1ea   : > { %s3161_s26 = sld [smem:[#allocation21_spill]] (!%p2180_p1) }
 0x1eb   : > { %v2791_v45 = vld [vmem:[#allocation2 + $0x18] sm:$0xff]  ;;  %1002 = vmatpush.bf16.msra.mxu0 %v2211_v16  ;;  %s3162_s27 = sld [smem:[#allocation22_spill]] (!%p2180_p1) }
 0x1ec   : > { %v2793_v46 = vld [vmem:[#allocation2 + $0x8] sm:$0xff]  ;;  %v871_v47 = vsel %vm861_vm14, %v2791_v45, 0.0 }
 0x1ed   : > { %v865_v48 = vsel %vm861_vm14, %v2793_v46, 0.0  ;;  %v2334_v50 = vpop.eup %2333 }
 0x1ee   : > { %v875_v51 = vmul.f32 32.0, %v2334_v50  ;;  %vm879_vm15 = vweird.f32 %v2334_v50 }
 0x1f0   : > { %872 = vadd.xlane.f32.xlu1 %v871_v47  ;;  %866 = vadd.xlane.f32.xlu0 %v865_v48  ;;  %v876_v52 = vsub.f32 1.0, %v875_v51  ;;  %v2832_v47 = vld [vmem:[%s2698_s17] sm:$0x3f] }
 0x1f1   : > { %v957_v51 = vperm.slane %v2832_v47, 0 }
 0x1f2   : > { %v877_v53 = vmul.f32 %v2334_v50, %v876_v52 }
 0x1f4   : > { %v878_v54 = vadd.f32 %v2334_v50, %v877_v53 }
 0x1f6   : > { %v2799_v55 = vsel %vm879_vm15, %v2334_v50, %v878_v54 }
 0x25b   : > { %v870_v56 = vpop.xlane.xlu1 %869  ;;  %v864_v57 = vpop.xlane.xlu0 %863 }
 0x25c   : > { %v883_v58 = vmul.f32 %v2799_v55, %v870_v56  ;;  %v881_v59 = vmul.f32 %v2799_v55, %v864_v57 }
 0x25e   : > { %v2804_v60 = vsub.f32 %v2783_v41, %v883_v58  ;;  %v2807_v61 = vsub.f32 %v2785_v42, %v881_v59  ;;  %v962_v59 = vperm.slane %v2832_v47, 1 }
 0x260   : > { %v891_v62 = vmul.f32 %v2804_v60, %v2804_v60  ;;  %v889_v63 = vmul.f32 %v2807_v61, %v2807_v61 }
 0x262   : > { %v899_v0 = vsel %vm861_vm14, %v891_v62, 0.0  ;;  %v893_v1 = vsel %vm861_vm14, %v889_v63, 0.0 }
 0x263   : > { %v873_v2 = vpop.xlane.xlu1 %872  ;;  %900 = vadd.xlane.f32.xlu0 %v899_v0  ;;  %894 = vadd.xlane.f32.xlu2 %v893_v1  ;;  %v867_v3 = vpop.xlane.xlu0 %866 }
 0x264   : > { %v884_v4 = vmul.f32 %v2799_v55, %v873_v2  ;;  %v882_v5 = vmul.f32 %v2799_v55, %v867_v3 }
 0x266   : > { %v2818_v6 = vsub.f32 %v2791_v45, %v884_v4  ;;  %v886_v7 = vsub.f32 %v2793_v46, %v882_v5 }
 0x268   : > { %v892_v8 = vmul.f32 %v2818_v6, %v2818_v6  ;;  %v890_v9 = vmul.f32 %v886_v7, %v886_v7 }
 0x26a   : > { %v902_v10 = vsel %vm861_vm14, %v892_v8, 0.0  ;;  %v896_v11 = vsel %vm861_vm14, %v890_v9, 0.0 }
 0x26b   : > { %903 = vadd.xlane.f32.xlu1 %v902_v10  ;;  %897 = vadd.xlane.f32.xlu2 %v896_v11 }
 0x2d6   : > { %v895_v13 = vpop.xlane.xlu2 %894  ;;  %v901_v15 = vpop.xlane.xlu0 %900 }
 0x2d7   : > { %v905_v14 = vmul.f32 %v895_v13, %v2799_v55  ;;  %v907_v18 = vmul.f32 %v901_v15, %v2799_v55  ;;  %v2331_v15 = vld [vmem:[%s3159_s14] ss:$0 sm:$0xff] }
 0x2d9   : > { %v909_v17 = vadd.f32 1e-05, %v905_v14  ;;  %v911_v19 = vadd.f32 1e-05, %v907_v18 }
 0x2db   : > { %2335 = vrsqrt.f32 %v909_v17  ;;  %vm919_vm1 = vweird.f32 %v909_v17  ;;  %vm939_vm8 = vweird.f32 %v911_v19 }
 0x2dc   : > { %2337 = vrsqrt.f32 %v911_v19 }
 0x2de   : > { %v904_v20 = vpop.xlane.xlu1 %903  ;;  %v898_v21 = vpop.xlane.xlu2 %897 }
 0x2df   : > { %v908_v22 = vmul.f32 %v904_v20, %v2799_v55  ;;  %v906_v23 = vmul.f32 %v898_v21, %v2799_v55 }
 0x2e1   : > { %v2336_v24 = vpop.eup %2335  ;;  %v912_v25 = vadd.f32 1e-05, %v908_v22  ;;  %v910_v26 = vadd.f32 1e-05, %v906_v23 }
 0x2e2   : > { %v914_v27 = vmul.f32 %v2336_v24, %v909_v17  ;;  %v2338_v30 = vpop.eup %2337  ;;  %vm920_vm0 = vweird.f32 %v2336_v24 }
 0x2e3   : > { %2339 = vrsqrt.f32 %v912_v25  ;;  %v934_v36 = vmul.f32 %v2338_v30, %v911_v19  ;;  %vm921_vm2 = vmor %vm919_vm1, %vm920_vm0  ;;  %vm929_vm4 = vweird.f32 %v910_v26  ;;  %vm949_vm6 = vweird.f32 %v912_v25 }
 0x2e4   : > { %v915_v28 = vmul.f32 %v2336_v24, %v914_v27  ;;  %2341 = vrsqrt.f32 %v910_v26  ;;  %vm940_vm9 = vweird.f32 %v2338_v30 }
 0x2e5   : > { %v935_v43 = vmul.f32 %v2338_v30, %v934_v36  ;;  %vm941_vm11 = vmor %vm939_vm8, %vm940_vm9 }
 0x2e6   : > { %v916_v29 = vmul.f32 0.5, %v915_v28 }
 0x2e7   : > { %v936_v52 = vmul.f32 0.5, %v935_v43 }
 0x2e8   : > { %v917_v31 = vsub.f32 1.5, %v916_v29 }
 0x2e9   : > { %v2340_v32 = vpop.eup %2339  ;;  %v937_v62 = vsub.f32 1.5, %v936_v52 }
 0x2ea   : > { %v2342_v33 = vpop.eup %2341  ;;  %v944_v34 = vmul.f32 %v2340_v32, %v912_v25  ;;  %v918_v35 = vmul.f32 %v2336_v24, %v917_v31  ;;  %vm950_vm7 = vweird.f32 %v2340_v32 }
 0x2eb   : > { %v924_v37 = vmul.f32 %v2342_v33, %v910_v26  ;;  %vm930_vm3 = vweird.f32 %v2342_v33  ;;  %vm951_vm10 = vmor %vm949_vm6, %vm950_vm7  ;;  %v938_v2 = vmul.f32 %v2338_v30, %v937_v62 }
 0x2ec   : > { %v945_v38 = vmul.f32 %v2340_v32, %v944_v34  ;;  %v922_v40 = vsel %vm921_vm2, %v2336_v24, %v918_v35  ;;  %vm931_vm5 = vmor %vm929_vm4, %vm930_vm3 }
 0x2ed   : > { %v925_v39 = vmul.f32 %v2342_v33, %v924_v37  ;;  %v953_v50 = vmul.f32 %v922_v40, %v2807_v61  ;;  %v942_v5 = vsel %vm941_vm11, %v2338_v30, %v938_v2 }
 0x2ee   : > { %v946_v48 = vmul.f32 0.5, %v945_v38  ;;  %v955_v8 = vmul.f32 %v942_v5, %v2804_v60 }
 0x2ef   : > { %v926_v44 = vmul.f32 0.5, %v925_v39  ;;  %v958_v58 = vmul.f32 %v957_v51, %v953_v50 }
 0x2f0   : > { %v947_v54 = vsub.f32 1.5, %v946_v48  ;;  %v960_v10 = vmul.f32 %v957_v51, %v955_v8 }
 0x2f1   : > { %v927_v49 = vsub.f32 1.5, %v926_v44  ;;  %v963_v61 = vadd.f32 %v962_v59, %v958_v58 }
 0x2f2   : > { %v948_v0 = vmul.f32 %v2340_v32, %v947_v54  ;;  %v965_v12 = vadd.f32 %v962_v59, %v960_v10 }
 0x2f3   : > { %v928_v53 = vmul.f32 %v2342_v33, %v927_v49 }
 0x2f4   : > { %v952_v4 = vsel %vm951_vm10, %v2340_v32, %v948_v0 }
 0x2f5   : > { %v932_v56 = vsel %vm931_vm5, %v2342_v33, %v928_v53 }
 0x2f6   : > { %v954_v57 = vmul.f32 %v932_v56, %v886_v7  ;;  %v956_v7 = vmul.f32 %v952_v4, %v2818_v6 }
 0x2f8   : > { %v959_v63 = vmul.f32 %v957_v51, %v954_v57  ;;  %v961_v9 = vmul.f32 %v957_v51, %v956_v7 }
 0x2fa   : > { %v964_v1 = vadd.f32 %v962_v59, %v959_v63  ;;  %v966_v11 = vadd.f32 %v962_v59, %v961_v9 }
 0x2fc   : > { %v967_v3 = vpack.c.bf16 %v964_v1, %v963_v61  ;;  %v968_v13 = vpack.c.bf16 %v966_v11, %v965_v12 }
 0x2fe   : > { %2114 = vmatmul.msk.bf16.vlgmr.msra.gmra.mxu0 %vm861_vm14, %v967_v3 }
 0x30e   : > { %2115 = vmatmul.msk.bf16.gmra.mxu0 %vm861_vm14, %v968_v13 }
 0x37b   : > { %v1004_v14 = vpop.f32.mrf.mxu0 }
 0x37c   : > { %v1005_v16 = vadd.f32 %v2331_v15, %v1004_v14 }
 0x37e   : > { %v1014_v18 = vpack.c.bf16 %v1005_v16, %v1005_v16 }
 0x380   : > { %v1020_v20 = vunpack.c.l.b16 %v1014_v18 }
 0x383   : > { %v1006_v17 = vpop.f32.mrf.mxu0 }
 0x384   : > { %v1007_v19 = vadd.f32 %v2331_v15, %v1006_v17 }
 0x386   : > { %v1015_v6 = vpack.c.bf16 %v1007_v19, %v1007_v19 }
 0x388   : > { %v1021_v60 = vunpack.c.l.b16 %v1015_v6 }
 0x38a   : > { %v2846_v21 = vpack.c.b16 %v1021_v60, %v1020_v20 }
 0x38b   : > { %v1009_v22 = vpop.f32.mrf.mxu0 }
 0x38c   : > { %1177 = vrot.lane.b32.xlu1 %v2846_v21, %s2508_s18  ;;  %1023 = vrot.lane.b32.xlu0 %v2846_v21, %s2509_s0  ;;  %v1010_v23 = vadd.f32 %v2331_v15, %v1009_v22 }
 0x38e   : > { %v1016_v25 = vpack.c.bf16 %v1010_v23, %v1010_v23 }
 0x390   : > { %v1048_v28 = vunpack.c.l.b16 %v1016_v25 }
 0x393   : > { %v1011_v24 = vpop.f32.mrf.mxu0 }
 0x394   : > { %v1012_v26 = vadd.f32 %v2331_v15, %v1011_v24 }
 0x396   : > { %v1017_v27 = vpack.c.bf16 %v1012_v26, %v1012_v26 }
 0x398   : > { %v1049_v29 = vunpack.c.l.b16 %v1017_v27 }
 0x39a   : > { %v2850_v30 = vpack.c.b16 %v1049_v29, %v1048_v28 }
 0x39c   : > { %1201 = vrot.lane.b32.xlu0 %v2850_v30, %s2508_s18  ;;  %1051 = vrot.lane.b32.xlu2 %v2850_v30, %s2509_s0 }
 0x3a4   : > { %1175 = vrot.lane.b32.xlu2 %v2846_v21, %s2510_s5 }
 0x3ac   : > { %1199 = vrot.lane.b32.xlu2 %v2850_v30, %s2510_s5 }
 0x3f6   : > { %v1052_v31 = vpop.permute.xlu2 %1051 }
 0x3f7   : > { %v1057_v32 = vsel %vm1025_vm12, %v1052_v31, 0 }
 0x3f8   : > { %1066 = vmatpush.bf16.xpose.msra.mxu2 %v1057_v32 }
 0x3fe   : > { %v1178_v33 = vpop.permute.xlu1 %1177  ;;  %v1024_v34 = vpop.permute.xlu0 %1023 }
 0x3ff   : > { %2117 = vmatmul.msk.bf16.vlgmr.msra.gmra.mxu2 %vm1025_vm12, %v2850_v30  ;;  %v1183_v35 = vsel %vm1025_vm12, %v1178_v33, 0  ;;  %v1030_v36 = vsel %vm1025_vm12, %v1024_v34, 0  ;;  %v1176_v37 = vpop.permute.xlu2 %1175 }
 0x400   : > { %1039 = vmatpush.bf16.xpose.msra.mxu1 %v1030_v36 }
 0x407   : > { %2116 = vmatmul.msk.bf16.vlgmr.msra.gmra.mxu1 %vm1025_vm12, %v2846_v21  ;;  %v1200_v40 = vpop.permute.xlu2 %1199 }
 0x408   : > { %1192 = vmatpush.bf16.xpose.msrb.mxu1 %v1183_v35 }
 0x40e   : > { %v1202_v38 = vpop.permute.xlu0 %1201 }
 0x40f   : > { %v1207_v39 = vsel %vm1025_vm12, %v1202_v38, 0 }
 0x410   : > { %1216 = vmatpush.bf16.xpose.msrb.mxu2 %v1207_v39 }
 0x417   : > { %2121 = vmatmul.msk.bf16.vlgmr.msrb.gmra.mxu2 %vm1025_vm12, %v1200_v40  ;;  %2120 = vmatmul.msk.bf16.vlgmr.msrb.gmra.mxu1 %vm1025_vm12, %v1176_v37 }
 0x482   : > { %v1068_v43 = vpop.f32.mrf.mxu2 }
 0x483   : > { %v1079_v44 = vsel %vm1025_vm12, %v1068_v43, -inf }
 0x484   : > { %1080 = vmax.xlane.f32.xlu1 %v1079_v44  ;;  %v1041_v48 = vpop.f32.mrf.mxu1 }
 0x485   : > { %v1073_v49 = vsel %vm1025_vm12, %v1041_v48, -inf }
 0x486   : > { %1074 = vmax.xlane.f32.xlu0 %v1073_v49 }
 0x48a   : > { %v1070_v50 = vpop.f32.mrf.mxu2 }
 0x48b   : > { %v1082_v52 = vsel %vm1025_vm12, %v1070_v50, -inf }
 0x48c   : > { %v1043_v51 = vpop.f32.mrf.mxu1 }
 0x48d   : > { %v1076_v58 = vsel %vm1025_vm12, %v1043_v51, -inf }
 0x48e   : > { %1083 = vmax.xlane.f32.xlu0 %v1082_v52 }
 0x494   : > { %v1194_v53 = vpop.f32.mrf.mxu1 }
 0x495   : > { %v1223_v54 = vsel %vm1025_vm12, %v1194_v53, -inf }
 0x496   : > { %1224 = vmax.xlane.f32.xlu2 %v1223_v54 }
 0x49a   : > { %v1218_v59 = vpop.f32.mrf.mxu2 }
 0x49b   : > { %v1229_v62 = vsel %vm1025_vm12, %v1218_v59, -inf }
 0x49c   : > { %v1196_v56 = vpop.f32.mrf.mxu1 }
 0x49d   : > { %v1226_v57 = vsel %vm1025_vm12, %v1196_v56, -inf }
 0x49e   : > { %1227 = vmax.xlane.f32.xlu1 %v1226_v57  ;;  %1077 = vmax.xlane.f32.xlu2 %v1076_v58 }
 0x4a2   : > { %1151 = vrot.lane.b32.xlu0 %v2850_v30, %s2511_s19  ;;  %v1220_v63 = vpop.f32.mrf.mxu2 }
 0x4a3   : > { %v1232_v0 = vsel %vm1025_vm12, %v1220_v63, -inf }
 0x4a6   : > { %1230 = vmax.xlane.f32.xlu1 %v1229_v62 }
 0x4cc   : > { %1233 = vmax.xlane.f32.xlu0 %v1232_v0 }
 0x4e0   : > { %1126 = vrot.lane.b32.xlu0 %v2846_v21, %s2511_s19 }
 0x4f7   : > { %v1081_v5 = vpop.xlane.xlu1 %1080 }
 0x4f8   : > { %v1087_v9 = vsub.f32 %v1068_v43, %v1081_v5 }
 0x4f9   : > { %v1075_v61 = vpop.xlane.xlu0 %1074 }
 0x4fa   : > { %v1085_v1 = vsub.f32 %v1041_v48, %v1075_v61  ;;  %v1093_v12 = vmul.f32 1.442695, %v1087_v9 }
 0x4fc   : > { %v1089_v2 = vmul.f32 1.442695, %v1085_v1 }
 0x4fe   : > { %2343 = vpow2.f32 %v1089_v2 }
 0x501   : > { %v1084_v10 = vpop.xlane.xlu0 %1083 }
 0x502   : > { %v1088_v16 = vsub.f32 %v1070_v50, %v1084_v10 }
 0x504   : > { %v2876_v3 = vpop.eup %2343  ;;  %v1095_v6 = vmul.f32 1.442695, %v1088_v16 }
 0x505   : > { %v1097_v4 = vsel %vm1025_vm12, %v2876_v3, 0.0 }
 0x506   : > { %1098 = vadd.xlane.f32.xlu2 %v1097_v4 }
 0x509   : > { %v1225_v7 = vpop.xlane.xlu2 %1224 }
 0x50a   : > { %v1235_v8 = vsub.f32 %v1194_v53, %v1225_v7 }
 0x50c   : > { %v1239_v11 = vmul.f32 1.442695, %v1235_v8 }
 0x50e   : > { %2345 = vpow2.f32 %v1239_v11 }
 0x50f   : > { %2347 = vpow2.f32 %v1093_v12 }
 0x511   : > { %v1228_v13 = vpop.xlane.xlu1 %1227  ;;  %v1078_v20 = vpop.xlane.xlu2 %1077 }
 0x512   : > { %v1236_v14 = vsub.f32 %v1196_v56, %v1228_v13  ;;  %v1086_v23 = vsub.f32 %v1043_v51, %v1078_v20 }
 0x514   : > { %v2880_v15 = vpop.eup %2345  ;;  %v1241_v17 = vmul.f32 1.442695, %v1236_v14  ;;  %v1152_v18 = vpop.permute.xlu0 %1151  ;;  %v1091_v26 = vmul.f32 1.442695, %v1086_v23 }
 0x515   : > { %1164 = vmatpush.bf16.msra.mxu3 %v1152_v18  ;;  %v1247_v19 = vsel %vm1025_vm12, %v2880_v15, 0.0  ;;  %v2348_v60 = vpop.eup %2347 }
 0x516   : > { %2349 = vpow2.f32 %v1241_v17  ;;  %1248 = vadd.xlane.f32.xlu2 %v1247_v19  ;;  %v1103_v25 = vsel %vm1025_vm12, %v2348_v60, 0.0 }
 0x517   : > { %2351 = vpow2.f32 %v1095_v6 }
 0x518   : > { %2353 = vpow2.f32 %v1091_v26 }
 0x519   : > { %v1231_v27 = vpop.xlane.xlu1 %1230 }
 0x51a   : > { %v1237_v29 = vsub.f32 %v1218_v59, %v1231_v27 }
 0x51c   : > { %v2884_v22 = vpop.eup %2349  ;;  %v1243_v32 = vmul.f32 1.442695, %v1237_v29 }
 0x51d   : > { %v1250_v24 = vsel %vm1025_vm12, %v2884_v22, 0.0  ;;  %v2352_v28 = vpop.eup %2351 }
 0x51e   : > { %1251 = vadd.xlane.f32.xlu1 %v1250_v24  ;;  %1104 = vadd.xlane.f32.xlu2 %v1103_v25  ;;  %v1106_v31 = vsel %vm1025_vm12, %v2352_v28, 0.0  ;;  %v2354_v33 = vpop.eup %2353  ;;  %2355 = vpow2.f32 %v1243_v32 }
 0x51f   : > { %v1100_v34 = vsel %vm1025_vm12, %v2354_v33, 0.0 }
 0x524   : > { %v2891_v35 = vpop.eup %2355 }
 0x525   : > { %v1253_v36 = vsel %vm1025_vm12, %v2891_v35, 0.0 }
 0x526   : > { %1107 = vadd.xlane.f32.xlu1 %v1106_v31 }
 0x52e   : > { %1101 = vadd.xlane.f32.xlu1 %v1100_v34 }
 0x536   : > { %1276 = vrot.lane.b32.xlu2 %v2846_v21, %s2512_s28  ;;  %1254 = vadd.xlane.f32.xlu1 %v1253_v36 }
 0x53f   : > { %v1234_v37 = vpop.xlane.xlu0 %1233 }
 0x540   : > { %v1238_v38 = vsub.f32 %v1220_v63, %v1234_v37 }
 0x542   : > { %v1245_v39 = vmul.f32 1.442695, %v1238_v38 }
 0x544   : > { %2357 = vpow2.f32 %v1245_v39 }
 0x54a   : > { %v2358_v40 = vpop.eup %2357 }
 0x54b   : > { %v1256_v43 = vsel %vm1025_vm12, %v2358_v40, 0.0 }
 0x54c   : > { %1257 = vadd.xlane.f32.xlu0 %v1256_v43 }
 0x54f   : > { %1301 = vrot.lane.b32.xlu1 %v2850_v30, %s2512_s28 }
 0x552   : > { %v1127_v44 = vpop.permute.xlu0 %1126 }
 0x553   : > { %1139 = vmatpush.bf16.msrb.mxu0 %v1127_v44 }
 0x579   : > { %v1099_v48 = vpop.xlane.xlu2 %1098 }
 0x589   : > { %v1249_v49 = vpop.xlane.xlu2 %1248 }
 0x591   : > { %v1252_v50 = vpop.xlane.xlu1 %1251  ;;  %v1105_v51 = vpop.xlane.xlu2 %1104 }
 0x592   : > { %2359 = vrcp.f32 %v1105_v51 }
 0x598   : > { %v2360_v53 = vpop.eup %2359 }
 0x599   : > { %v1277_v52 = vpop.permute.xlu2 %1276  ;;  %v1108_v21 = vpop.xlane.xlu1 %1107  ;;  %v1115_v54 = vmul.f32 %v2360_v53, %v2348_v60 }
 0x59a   : > { %2361 = vrcp.f32 %v1108_v21  ;;  %1289 = vmatpush.bf16.msrb.mxu3 %v1277_v52  ;;  %v2213_v52 = vld [vmem:[%s2692_s12] sm:$0xff] }
 0x59b   : > { %2363 = vrcp.f32 %v1099_v48  ;;  %v1119_v59 = vpack.c.bf16 %v1115_v54, %v1115_v54 }
 0x59c   : > { %2365 = vrcp.f32 %v1252_v50  ;;  %v2214_v50 = vld [vmem:[%s2692_s12 + $0x8] sm:$0xff] }
 0x59d   : > { %v1148_v0 = vunpack.c.l.b16 %v1119_v59  ;;  %1381 = vmatpush.bf16.msra.mxu1 %v2214_v50 }
 0x5a0   : > { %v2362_v56 = vpop.eup %2361 }
 0x5a1   : > { %v1102_v57 = vpop.xlane.xlu1 %1101  ;;  %v1116_v58 = vmul.f32 %v2362_v56, %v2352_v28  ;;  %v2364_v30 = vpop.eup %2363  ;;  %1382 = vmatpush.bf16.msra.mxu1 %v2213_v52 }
 0x5a2   : > { %2367 = vrcp.f32 %v1102_v57  ;;  %v1113_v63 = vmul.f32 %v2364_v30, %v2876_v3  ;;  %v2366_v1 = vpop.eup %2365 }
 0x5a3   : > { %v1120_v62 = vpack.c.bf16 %v1116_v58, %v1116_v58  ;;  %2369 = vrcp.f32 %v1249_v49  ;;  %v1264_v9 = vmul.f32 %v2366_v1, %v2884_v22 }
 0x5a4   : > { %v1117_v5 = vpack.c.bf16 %v1113_v63, %v1113_v63 }
 0x5a5   : > { %v1149_v61 = vunpack.c.l.b16 %v1120_v62  ;;  %v1268_v14 = vpack.c.bf16 %v1264_v9, %v1264_v9 }
 0x5a6   : > { %v1123_v11 = vunpack.c.l.b16 %v1117_v5 }
 0x5a7   : > { %v1150_v2 = vpack.c.b16 %v1149_v61, %v1148_v0  ;;  %v1274_v17 = vunpack.c.l.b16 %v1268_v14 }
 0x5a8   : > { %v2368_v4 = vpop.eup %2367 }
 0x5a9   : > { %v1114_v7 = vmul.f32 %v2368_v4, %v2354_v33  ;;  %2119 = vmatmul.msk.bf16.vlgmr.msra.gmra.mxu3 %vm1025_vm12, %v1150_v2  ;;  %v2370_v8 = vpop.eup %2369  ;;  %v1255_v19 = vpop.xlane.xlu1 %1254 }
 0x5aa   : > { %v1263_v12 = vmul.f32 %v2370_v8, %v2880_v15  ;;  %2371 = vrcp.f32 %v1255_v19  ;;  %v1398_v8 = vperm.slane %v2832_v47, 2 }
 0x5ab   : > { %v1118_v10 = vpack.c.bf16 %v1114_v7, %v1114_v7 }
 0x5ac   : > { %v1267_v3 = vpack.c.bf16 %v1263_v12, %v1263_v12 }
 0x5ad   : > { %v1124_v13 = vunpack.c.l.b16 %v1118_v10 }
 0x5ae   : > { %v1273_v18 = vunpack.c.l.b16 %v1267_v3 }
 0x5af   : > { %v1125_v16 = vpack.c.b16 %v1124_v13, %v1123_v11 }
 0x5b0   : > { %v1275_v6 = vpack.c.b16 %v1274_v17, %v1273_v18  ;;  %v2372_v60 = vpop.eup %2371 }
 0x5b1   : > { %2118 = vmatmul.msk.bf16.vlgmr.msrb.gmra.mxu0 %vm1025_vm12, %v1125_v16  ;;  %v1265_v15 = vmul.f32 %v2372_v60, %v2891_v35 }
 0x5b3   : > { %v1269_v24 = vpack.c.bf16 %v1265_v15, %v1265_v15 }
 0x5b5   : > { %v1298_v27 = vunpack.c.l.b16 %v1269_v24 }
 0x5b9   : > { %2122 = vmatmul.msk.bf16.vlgmr.msrb.gmra.mxu3 %vm1025_vm12, %v1275_v6 }
 0x5bf   : > { %v1258_v20 = vpop.xlane.xlu0 %1257 }
 0x5c0   : > { %2373 = vrcp.f32 %v1258_v20 }
 0x5c1   : > { %v1302_v22 = vpop.permute.xlu1 %1301 }
 0x5c2   : > { %1314 = vmatpush.bf16.msra.mxu0 %v1302_v22 }
 0x5c6   : > { %v2374_v23 = vpop.eup %2373 }
 0x5c7   : > { %v1266_v25 = vmul.f32 %v2374_v23, %v2358_v40 }
 0x5c9   : > { %v1270_v26 = vpack.c.bf16 %v1266_v25, %v1266_v25 }
 0x5cb   : > { %v1299_v28 = vunpack.c.l.b16 %v1270_v26 }
 0x5cd   : > { %v1300_v29 = vpack.c.b16 %v1299_v28, %v1298_v27 }
 0x5cf   : > { %2123 = vmatmul.msk.bf16.vlgmr.msra.gmra.mxu0 %vm1025_vm12, %v1300_v29 }
 0x62c   : > { %v1166_v31 = vpop.f32.mrf.mxu3 }
 0x62d   : > { %v1173_v33 = vpack.c.bf16 %v1166_v31, %v1166_v31 }
 0x62e   : > { %v1141_v32 = vpop.f32.mrf.mxu0 }
 0x62f   : > { %v1171_v36 = vpack.c.bf16 %v1141_v32, %v1141_v32  ;;  %v1331_v39 = vunpack.c.l.b16 %v1173_v33 }
 0x631   : > { %v1329_v44 = vunpack.c.l.b16 %v1171_v36 }
 0x634   : > { %v1168_v34 = vpop.f32.mrf.mxu3 }
 0x635   : > { %v1174_v37 = vpack.c.bf16 %v1168_v34, %v1168_v34 }
 0x636   : > { %v1143_v38 = vpop.f32.mrf.mxu0 }
 0x637   : > { %v1332_v35 = vunpack.c.l.b16 %v1174_v37  ;;  %v1172_v43 = vpack.c.bf16 %v1143_v38, %v1143_v38 }
 0x639   : > { %v1334_v40 = vpack.c.b16 %v1332_v35, %v1331_v39  ;;  %v1330_v48 = vunpack.c.l.b16 %v1172_v43  ;;  %v2216_v43 = vld [vmem:[%s2703_s20 + $0x8] sm:$0xff] }
 0x63a   : > { %1535 = vmatpush.bf16.msra.mxu2 %v2216_v43 }
 0x63b   : > { %v1333_v49 = vpack.c.b16 %v1330_v48, %v1329_v44 }
 0x63c   : > { %v1291_v51 = vpop.f32.mrf.mxu3 }
 0x63d   : > { %v1321_v21 = vpack.c.bf16 %v1291_v51, %v1291_v51 }
 0x63f   : > { %v1339_v56 = vunpack.c.l.b16 %v1321_v21 }
 0x644   : > { %v1293_v53 = vpop.f32.mrf.mxu3 }
 0x645   : > { %v1322_v54 = vpack.c.bf16 %v1293_v53, %v1293_v53 }
 0x647   : > { %v1340_v57 = vunpack.c.l.b16 %v1322_v54 }
 0x649   : > { %v1343_v58 = vpack.c.b16 %v1340_v57, %v1339_v56 }
 0x64b   : > { %1345 = vrot.lane.b32.xlu2 %v1343_v58, %s2513_s24 }
 0x64c   : > { %v1316_v59 = vpop.f32.mrf.mxu0 }
 0x64d   : > { %v1323_v30 = vpack.c.bf16 %v1316_v59, %v1316_v59 }
 0x64f   : > { %v1341_v0 = vunpack.c.l.b16 %v1323_v30 }
 0x654   : > { %v1318_v62 = vpop.f32.mrf.mxu0 }
 0x655   : > { %v1324_v63 = vpack.c.bf16 %v1318_v62, %v1318_v62 }
 0x657   : > { %v1342_v61 = vunpack.c.l.b16 %v1324_v63 }
 0x659   : > { %v1344_v1 = vpack.c.b16 %v1342_v61, %v1341_v0 }
 0x65b   : > { %1347 = vrot.lane.b32.xlu2 %v1344_v1, %s2513_s24 }
 0x6a5   : > { %v1346_v2 = vpop.permute.xlu2 %1345 }
 0x6a6   : > { %v1351_v4 = vsel %vm1025_vm12, %v1333_v49, %v1346_v2  ;;  %v2215_v49 = vld [vmem:[%s2703_s20] sm:$0xff] }
 0x6a7   : > { %2132 = vmatmul.msk.bf16.vlgmr.msra.gmra.mxu1 %vm861_vm14, %v1351_v4  ;;  %1536 = vmatpush.bf16.msra.mxu2 %v2215_v49  ;;  %v2220_v49 = vld [vmem:[%s2713_s22 + $0x18] sm:$0xff] }
 0x6b5   : > { %v1348_v5 = vpop.permute.xlu2 %1347 }
 0x6b6   : > { %v1354_v7 = vsel %vm1025_vm12, %v1334_v40, %v1348_v5 }
 0x6b7   : > { %2133 = vmatmul.msk.bf16.gmra.mxu1 %vm861_vm14, %v1354_v7 }
 0x724   : > { %v1384_v9 = vpop.f32.mrf.mxu1 }
 0x725   : > { %v1394_v10 = vadd.f32 %v1384_v9, %v2785_v42  ;;  %v1491_v9 = vperm.slane %v2832_v47, 3 }
 0x727   : > { %v2914_v11 = vadd.f32 %v1398_v8, %v1394_v10 }
 0x729   : > { %v1403_v12 = vsel %vm861_vm14, %v2914_v11, 0.0 }
 0x72a   : > { %1404 = vadd.xlane.f32.xlu1 %v1403_v12 }
 0x72c   : > { %v1386_v13 = vpop.f32.mrf.mxu1 }
 0x72d   : > { %v1395_v14 = vadd.f32 %v1386_v13, %v2793_v46 }
 0x72f   : > { %v2919_v16 = vadd.f32 %v1398_v8, %v1395_v14 }
 0x731   : > { %v1406_v3 = vsel %vm861_vm14, %v2919_v16, 0.0 }
 0x732   : > { %1407 = vadd.xlane.f32.xlu2 %v1406_v3 }
 0x734   : > { %v1389_v17 = vpop.f32.mrf.mxu1 }
 0x735   : > { %v1396_v18 = vadd.f32 %v1389_v17, %v2783_v41 }
 0x737   : > { %v2924_v19 = vadd.f32 %v1398_v8, %v1396_v18  ;;  %v1496_v18 = vperm.slane %v2832_v47, 4 }
 0x739   : > { %v1409_v42 = vsel %vm861_vm14, %v2924_v19, 0.0 }
 0x73a   : > { %1410 = vadd.xlane.f32.xlu0 %v1409_v42 }
 0x73c   : > { %v1391_v6 = vpop.f32.mrf.mxu1 }
 0x73d   : > { %v1397_v20 = vadd.f32 %v1391_v6, %v2791_v45 }
 0x73f   : > { %v2929_v60 = vadd.f32 %v1398_v8, %v1397_v20 }
 0x741   : > { %v1412_v46 = vsel %vm861_vm14, %v2929_v60, 0.0 }
 0x742   : > { %1413 = vadd.xlane.f32.xlu0 %v1412_v46 }
 0x79d   : > { %v1405_v22 = vpop.xlane.xlu1 %1404 }
 0x79e   : > { %v1415_v15 = vmul.f32 %v1405_v22, %v2799_v55 }
 0x7a0   : > { %v1419_v41 = vsub.f32 %v2914_v11, %v1415_v15 }
 0x7a2   : > { %v1423_v23 = vmul.f32 %v1419_v41, %v1419_v41 }
 0x7a4   : > { %v1427_v24 = vsel %vm861_vm14, %v1423_v23, 0.0 }
 0x7a5   : > { %1428 = vadd.xlane.f32.xlu0 %v1427_v24  ;;  %v1408_v25 = vpop.xlane.xlu2 %1407 }
 0x7a6   : > { %v1416_v26 = vmul.f32 %v1408_v25, %v2799_v55 }
 0x7a8   : > { %v2938_v45 = vsub.f32 %v2919_v16, %v1416_v26 }
 0x7aa   : > { %v1424_v27 = vmul.f32 %v2938_v45, %v2938_v45 }
 0x7ac   : > { %v1430_v28 = vsel %vm861_vm14, %v1424_v27, 0.0 }
 0x7ad   : > { %v1411_v29 = vpop.xlane.xlu0 %1410  ;;  %1431 = vadd.xlane.f32.xlu0 %v1430_v28 }
 0x7ae   : > { %v1417_v31 = vmul.f32 %v1411_v29, %v2799_v55 }
 0x7b0   : > { %v2945_v32 = vsub.f32 %v2924_v19, %v1417_v31 }
 0x7b2   : > { %v1425_v33 = vmul.f32 %v2945_v32, %v2945_v32 }
 0x7b4   : > { %v1433_v34 = vsel %vm861_vm14, %v1425_v33, 0.0 }
 0x7b5   : > { %1434 = vadd.xlane.f32.xlu1 %v1433_v34  ;;  %v1414_v36 = vpop.xlane.xlu0 %1413 }
 0x7b6   : > { %v1418_v37 = vmul.f32 %v1414_v36, %v2799_v55 }
 0x7b8   : > { %v2952_v38 = vsub.f32 %v2929_v60, %v1418_v37 }
 0x7ba   : > { %v1426_v39 = vmul.f32 %v2952_v38, %v2952_v38 }
 0x7bc   : > { %v1436_v35 = vsel %vm861_vm14, %v1426_v39, 0.0 }
 0x7bd   : > { %1437 = vadd.xlane.f32.xlu2 %v1436_v35 }
 0x818   : > { %v1429_v44 = vpop.xlane.xlu0 %1428 }
 0x819   : > { %v1439_v40 = vmul.f32 %v1429_v44, %v2799_v55  ;;  %v2224_v44 = vld [vmem:[%s2713_s22 + $0x38] sm:$0xff] }
 0x81a   : > { %1699 = vmatpush.bf16.msra.mxu3 %v2224_v44 }
 0x81b   : > { %v1443_v48 = vadd.f32 1e-05, %v1439_v40  ;;  %v2222_v40 = vld [vmem:[%s2713_s22 + $0x28] sm:$0xff] }
 0x81d   : > { %2375 = vrsqrt.f32 %v1443_v48  ;;  %vm1453_vm15 = vweird.f32 %v1443_v48 }
 0x820   : > { %v1432_v50 = vpop.xlane.xlu0 %1431 }
 0x821   : > { %v1440_v51 = vmul.f32 %v1432_v50, %v2799_v55 }
 0x823   : > { %v2376_v52 = vpop.eup %2375  ;;  %v1444_v21 = vadd.f32 1e-05, %v1440_v51 }
 0x824   : > { %v1448_v53 = vmul.f32 %v2376_v52, %v1443_v48  ;;  %vm1454_vm13 = vweird.f32 %v2376_v52  ;;  %v2221_v48 = vld [vmem:[%s2713_s22 + $0x20] sm:$0xff] }
 0x825   : > { %2377 = vrsqrt.f32 %v1444_v21  ;;  %vm1455_vm0 = vmor %vm1453_vm15, %vm1454_vm13  ;;  %vm1463_vm2 = vweird.f32 %v1444_v21 }
 0x826   : > { %v1449_v54 = vmul.f32 %v2376_v52, %v1448_v53 }
 0x828   : > { %v1450_v56 = vmul.f32 0.5, %v1449_v54  ;;  %v1435_v57 = vpop.xlane.xlu1 %1434  ;;  %v2218_v54 = vld [vmem:[%s2713_s22 + $0x8] sm:$0xff] }
 0x829   : > { %v1441_v58 = vmul.f32 %v1435_v57, %v2799_v55 }
 0x82a   : > { %v1451_v59 = vsub.f32 1.5, %v1450_v56 }
 0x82b   : > { %v2378_v30 = vpop.eup %2377  ;;  %v1445_v62 = vadd.f32 1e-05, %v1441_v58  ;;  %v2217_v58 = vld [vmem:[%s2713_s22] sm:$0xff] }
 0x82c   : > { %v1452_v63 = vmul.f32 %v2376_v52, %v1451_v59  ;;  %v1458_v0 = vmul.f32 %v2378_v30, %v1444_v21  ;;  %vm1464_vm1 = vweird.f32 %v2378_v30 }
 0x82d   : > { %2379 = vrsqrt.f32 %v1445_v62  ;;  %vm1465_vm3 = vmor %vm1463_vm2, %vm1464_vm1  ;;  %vm1473_vm5 = vweird.f32 %v1445_v62 }
 0x82e   : > { %v1459_v61 = vmul.f32 %v2378_v30, %v1458_v0  ;;  %v1456_v1 = vsel %vm1455_vm0, %v2376_v52, %v1452_v63  ;;  %v2219_v52 = vld [vmem:[%s2713_s22 + $0x10] sm:$0xff] }
 0x82f   : > { %v1487_v10 = vmul.f32 %v1456_v1, %v1419_v41 }
 0x830   : > { %v1460_v2 = vmul.f32 0.5, %v1459_v61  ;;  %v1438_v4 = vpop.xlane.xlu2 %1437 }
 0x831   : > { %v1442_v5 = vmul.f32 %v1438_v4, %v2799_v55  ;;  %v1492_v42 = vmul.f32 %v1491_v9, %v1487_v10 }
 0x832   : > { %v1461_v7 = vsub.f32 1.5, %v1460_v2 }
 0x833   : > { %v2380_v8 = vpop.eup %2379  ;;  %v1446_v12 = vadd.f32 1e-05, %v1442_v5  ;;  %v1497_v23 = vadd.f32 %v1496_v18, %v1492_v42 }
 0x834   : > { %v1462_v13 = vmul.f32 %v2378_v30, %v1461_v7  ;;  %v1468_v14 = vmul.f32 %v2380_v8, %v1445_v62  ;;  %vm1474_vm4 = vweird.f32 %v2380_v8 }
 0x835   : > { %2381 = vrsqrt.f32 %v1446_v12  ;;  %vm1475_vm6 = vmor %vm1473_vm5, %vm1474_vm4  ;;  %vm1483_vm8 = vweird.f32 %v1446_v12 }
 0x836   : > { %v1466_v3 = vsel %vm1465_vm3, %v2378_v30, %v1462_v13  ;;  %v1469_v17 = vmul.f32 %v2380_v8, %v1468_v14 }
 0x837   : > { %v1488_v6 = vmul.f32 %v1466_v3, %v2938_v45 }
 0x838   : > { %v1470_v20 = vmul.f32 0.5, %v1469_v17 }
 0x839   : > { %v1493_v46 = vmul.f32 %v1491_v9, %v1488_v6 }
 0x83a   : > { %v1471_v22 = vsub.f32 1.5, %v1470_v20 }
 0x83b   : > { %v2382_v15 = vpop.eup %2381  ;;  %v1498_v24 = vadd.f32 %v1496_v18, %v1493_v46 }
 0x83c   : > { %v1472_v41 = vmul.f32 %v2380_v8, %v1471_v22  ;;  %v1478_v25 = vmul.f32 %v2382_v15, %v1446_v12  ;;  %vm1484_vm7 = vweird.f32 %v2382_v15 }
 0x83d   : > { %v1501_v26 = vpack.c.bf16 %v1498_v24, %v1497_v23  ;;  %vm1485_vm9 = vmor %vm1483_vm8, %vm1484_vm7 }
 0x83e   : > { %v1479_v27 = vmul.f32 %v2382_v15, %v1478_v25  ;;  %v1476_v28 = vsel %vm1475_vm6, %v2380_v8, %v1472_v41 }
 0x83f   : > { %2142 = vmatmul.msk.bf16.vlgmr.msra.gmra.mxu2 %vm861_vm14, %v1501_v26  ;;  %v1489_v45 = vmul.f32 %v1476_v28, %v2945_v32  ;;  %v2223_v32 = vld [vmem:[%s2713_s22 + $0x30] sm:$0xff] }
 0x840   : > { %v1480_v47 = vmul.f32 0.5, %v1479_v27  ;;  %1700 = vmatpush.bf16.msra.mxu3 %v2223_v32 }
 0x841   : > { %v1494_v36 = vmul.f32 %v1491_v9, %v1489_v45 }
 0x842   : > { %v1481_v29 = vsub.f32 1.5, %v1480_v47 }
 0x843   : > { %v1499_v39 = vadd.f32 %v1496_v18, %v1494_v36 }
 0x844   : > { %v1482_v31 = vmul.f32 %v2382_v15, %v1481_v29  ;;  %1701 = vmatpush.bf16.msra.mxu3 %v2222_v40 }
 0x846   : > { %v1486_v33 = vsel %vm1485_vm9, %v2382_v15, %v1482_v31 }
 0x847   : > { %v1490_v34 = vmul.f32 %v1486_v33, %v2952_v38  ;;  %v2332_v38 = vld [vmem:[%s624_s15] ss:$0 sm:$0xff] }
 0x848   : > { %1702 = vmatpush.bf16.msra.mxu3 %v2221_v48 }
 0x849   : > { %v1495_v37 = vmul.f32 %v1491_v9, %v1490_v34 }
 0x84b   : > { %v1500_v35 = vadd.f32 %v1496_v18, %v1495_v37 }
 0x84c   : > { %1703 = vmatpush.bf16.msra.mxu3 %v2220_v49 }
 0x84d   : > { %v1502_v43 = vpack.c.bf16 %v1500_v35, %v1499_v39 }
 0x84f   : > { %2143 = vmatmul.msk.bf16.gmra.mxu2 %vm861_vm14, %v1502_v43 }
 0x850   : > { %1704 = vmatpush.bf16.msra.mxu3 %v2219_v52 }
 0x854   : > { %1705 = vmatpush.bf16.msra.mxu3 %v2218_v54 }
 0x858   : > { %1706 = vmatpush.bf16.msra.mxu3 %v2217_v58 }
 0x8c2   : > { %v1538_v50 = vpop.f32.mrf.mxu2 }
 0x8c3   : > { %v2980_v51 = vadd.f32 %v2332_v38, %v1538_v50 }
 0x8c5   : > { %v2144_v21 = vmul.f32 -1.702, %v2980_v51 }
 0x8c7   : > { %v1556_v53 = vmul.f32 1.442695, %v2144_v21 }
 0x8c9   : > { %2383 = vpow2.f32 %v1556_v53 }
 0x8ca   : > { %v1540_v56 = vpop.f32.mrf.mxu2 }
 0x8cb   : > { %v1541_v57 = vadd.f32 %v2332_v38, %v1540_v56 }
 0x8cd   : > { %v2145_v59 = vmul.f32 -1.702, %v1541_v57 }
 0x8cf   : > { %v2384_v30 = vpop.eup %2383  ;;  %v1558_v62 = vmul.f32 1.442695, %v2145_v59 }
 0x8d0   : > { %v1564_v63 = vadd.f32 1.0, %v2384_v30 }
 0x8d1   : > { %2385 = vpow2.f32 %v1558_v62 }
 0x8d2   : > { %2387 = vrcp.f32 %v1564_v63  ;;  %v1543_v0 = vpop.f32.mrf.mxu2  ;;  %v1579_v46 = vand.u32 2147483648, %v1564_v63  ;;  %vm1573_vm11 = vweird.f32 %v1564_v63  ;;  %v1577_v22 = vand.u32 2147483647, %v1564_v63 }
 0x8d3   : > { %v2986_v61 = vadd.f32 %v2332_v38, %v1543_v0 }
 0x8d4   : > { %v1580_v26 = vor.u32 1.1754944e-38, %v1579_v46  ;;  %vm1578_vm15 = vcmp.eq.f32.partialorder %v1577_v22, 8.507059e+37 }
 0x8d5   : > { %v2146_v1 = vmul.f32 -1.702, %v2986_v61 }
 0x8d7   : > { %v2386_v2 = vpop.eup %2385  ;;  %v1560_v4 = vmul.f32 1.442695, %v2146_v1  ;;  %v2399_v1 = vld [vmem:[%s2698_s17] sm:$0x3f]  ;;  %s3160_s17 = sld [smem:[#allocation23_spill]] (!%p2180_p1) }
 0x8d8   : > { %v2388_v5 = vpop.eup %2387  ;;  %v1565_v7 = vadd.f32 1.0, %v2386_v2  ;;  %v1650_v2 = vperm.slane %v2399_v1, 5 }
 0x8d9   : > { %v1569_v8 = vmul.f32 %v2388_v5, %v1564_v63  ;;  %2389 = vpow2.f32 %v1560_v4  ;;  %vm1574_vm10 = vweird.f32 %v2388_v5 }
 0x8da   : > { %2391 = vrcp.f32 %v1565_v7  ;;  %v1545_v9 = vpop.f32.mrf.mxu2  ;;  %vm1575_vm12 = vmor %vm1573_vm11, %vm1574_vm10  ;;  %v1594_v23 = vand.u32 2147483648, %v1565_v7  ;;  %v1592_v25 = vand.u32 2147483647, %v1565_v7  ;;  %vm1588_vm0 = vweird.f32 %v1565_v7 }
 0x8db   : > { %v1570_v10 = vsub.f32 1.0, %v1569_v8  ;;  %v2989_v12 = vadd.f32 %v2332_v38, %v1545_v9 }
 0x8dc   : > { %v1595_v45 = vor.u32 1.1754944e-38, %v1594_v23  ;;  %vm1593_vm2 = vcmp.eq.f32.partialorder %v1592_v25, 8.507059e+37 }
 0x8dd   : > { %v1571_v13 = vmul.f32 %v2388_v5, %v1570_v10  ;;  %v2147_v14 = vmul.f32 -1.702, %v2989_v12 }
 0x8df   : > { %v2390_v3 = vpop.eup %2389  ;;  %v1562_v17 = vmul.f32 1.442695, %v2147_v14  ;;  %v1572_v6 = vadd.f32 %v2388_v5, %v1571_v13 }
 0x8e0   : > { %v2392_v18 = vpop.eup %2391  ;;  %v1566_v42 = vadd.f32 1.0, %v2390_v3 }
 0x8e1   : > { %v1584_v20 = vmul.f32 %v2392_v18, %v1565_v7  ;;  %2393 = vpow2.f32 %v1562_v17  ;;  %v1576_v24 = vsel %vm1575_vm12, %v2388_v5, %v1572_v6  ;;  %vm1589_vm13 = vweird.f32 %v2392_v18 }
 0x8e2   : > { %2395 = vrcp.f32 %v1566_v42  ;;  %v1581_v29 = vsel %vm1578_vm15, %v1580_v26, %v1576_v24  ;;  %vm1590_vm1 = vmor %vm1588_vm0, %vm1589_vm13  ;;  %v1609_v38 = vand.u32 2147483648, %v1566_v42  ;;  %vm1603_vm4 = vweird.f32 %v1566_v42 }
 0x8e3   : > { %v1585_v15 = vsub.f32 1.0, %v1584_v20  ;;  %v1628_v37 = vmul.f32 %v1581_v29, %v2980_v51  ;;  %v1607_v49 = vand.u32 2147483647, %v1566_v42 }
 0x8e4   : > { %v1610_v54 = vor.u32 1.1754944e-38, %v1609_v38 }
 0x8e5   : > { %v1586_v41 = vmul.f32 %v2392_v18, %v1585_v15  ;;  %vm1608_vm7 = vcmp.eq.f32.partialorder %v1607_v49, 8.507059e+37 }
 0x8e7   : > { %v2394_v27 = vpop.eup %2393  ;;  %v1587_v28 = vadd.f32 %v2392_v18, %v1586_v41 }
 0x8e8   : > { %v2396_v47 = vpop.eup %2395  ;;  %v1567_v31 = vadd.f32 1.0, %v2394_v27 }
 0x8e9   : > { %v1591_v33 = vsel %vm1590_vm1, %v2392_v18, %v1587_v28  ;;  %v1599_v34 = vmul.f32 %v2396_v47, %v1566_v42  ;;  %vm1604_vm3 = vweird.f32 %v2396_v47 }
 0x8ea   : > { %v1596_v36 = vsel %vm1593_vm2, %v1595_v45, %v1591_v33  ;;  %2397 = vrcp.f32 %v1567_v31  ;;  %vm1605_vm5 = vmor %vm1603_vm4, %vm1604_vm3  ;;  %v1624_v52 = vand.u32 2147483648, %v1567_v31  ;;  %v1622_v51 = vand.u32 2147483647, %v1567_v31 }
 0x8eb   : > { %v1629_v39 = vmul.f32 %v1596_v36, %v1541_v57  ;;  %v1600_v35 = vsub.f32 1.0, %v1599_v34  ;;  %vm1618_vm8 = vweird.f32 %v1567_v31 }
 0x8ec   : > { %v1625_v58 = vor.u32 1.1754944e-38, %v1624_v52  ;;  %vm1623_vm10 = vcmp.eq.f32.partialorder %v1622_v51, 8.507059e+37 }
 0x8ed   : > { %v1632_v43 = vpack.c.bf16 %v1629_v39, %v1628_v37  ;;  %v1601_v44 = vmul.f32 %v2396_v47, %v1600_v35 }
 0x8ef   : > { %1707 = vmatmul.bf16.vlgmr.msra.gmra.mxu3 %v1632_v43  ;;  %v1602_v40 = vadd.f32 %v2396_v47, %v1601_v44 }
 0x8f0   : > { %v2398_v32 = vpop.eup %2397 }
 0x8f1   : > { %v1614_v48 = vmul.f32 %v2398_v32, %v1567_v31  ;;  %v1606_v21 = vsel %vm1605_vm5, %v2396_v47, %v1602_v40  ;;  %vm1619_vm6 = vweird.f32 %v2398_v32 }
 0x8f2   : > { %v1611_v57 = vsel %vm1608_vm7, %v1610_v54, %v1606_v21  ;;  %vm1620_vm9 = vmor %vm1618_vm8, %vm1619_vm6 }
 0x8f3   : > { %v1615_v50 = vsub.f32 1.0, %v1614_v48  ;;  %v1630_v62 = vmul.f32 %v1611_v57, %v2986_v61 }
 0x8f5   : > { %v1616_v53 = vmul.f32 %v2398_v32, %v1615_v50 }
 0x8f7   : > { %v1617_v56 = vadd.f32 %v2398_v32, %v1616_v53 }
 0x8f9   : > { %v1621_v59 = vsel %vm1620_vm9, %v2398_v32, %v1617_v56 }
 0x8fa   : > { %v1626_v30 = vsel %vm1623_vm10, %v1625_v58, %v1621_v59 }
 0x8fb   : > { %v1631_v63 = vmul.f32 %v1626_v30, %v2989_v12 }
 0x8fd   : > { %v1633_v0 = vpack.c.bf16 %v1631_v63, %v1630_v62 }
 0x8ff   : > { %1712 = vmatmul.bf16.gmra.mxu3 %v1633_v0 }
 0x972   : > { %v1708_v4 = vpop.f32.mrf.mxu3 }
 0x973   : > { %v1709_v5 = vadd.f32 %v1708_v4, %v1650_v2 }
 0x975   : > { %v1718_v7 = vadd.f32 %v1709_v5, %v2914_v11 }
 0x977   : > { %1722 = vst.msk [vmem:[#allocation2] sm:$0xff] %vm861_vm14, %v1718_v7 }
 0x97a   : > { %v1710_v8 = vpop.f32.mrf.mxu3 }
 0x97b   : > { %v1711_v9 = vadd.f32 %v1710_v8, %v1650_v2 }
 0x97d   : > { %v1719_v10 = vadd.f32 %v1711_v9, %v2919_v16 }
 0x97f   : > { %1723 = vst.msk [vmem:[#allocation2 + $0x8] sm:$0xff] %vm861_vm14, %v1719_v10 }
 0x982   : > { %v1713_v13 = vpop.f32.mrf.mxu3 }
 0x983   : > { %v1714_v61 = vadd.f32 %v1713_v13, %v1650_v2 }
 0x985   : > { %v1720_v12 = vadd.f32 %v1714_v61, %v2924_v19 }
 0x987   : > { %1724 = vst.msk [vmem:[#allocation2 + $0x10] sm:$0xff] %vm861_vm14, %v1720_v12 }
 0x98a   : > { %v1715_v14 = vpop.f32.mrf.mxu3 }
 0x98b   : > { %v1716_v3 = vadd.f32 %v1715_v14, %v1650_v2  ;;  %1729 = sbr.rel (%p2180_p1) target bundleno = 2862 (0xb2e), region = 88 }
 0x98d   : > { %v1721_v17 = vadd.f32 %v1716_v3, %v2929_v60 }
 0x98f   : > { %1725 = vst.msk [vmem:[#allocation2 + $0x18] sm:$0xff] %vm861_vm14, %v1721_v17 }
 0x990   : > { %v1738_v11 = vsel %vm861_vm14, %v1720_v12, 0.0  ;;  %v1732_v16 = vsel %vm861_vm14, %v1718_v7, 0.0  ;;  %v1741_v18 = vsel %vm861_vm14, %v1721_v17, 0.0  ;;  %v1735_v19 = vsel %vm861_vm14, %v1719_v10, 0.0  ;;  %v2226_v36 = vld [vmem:[%s3160_s17 + $0x8] sm:$0xff]  ;;  %v2225_v44 = vld [vmem:[%s3160_s17] sm:$0xff] }
 0x991   : > { %1739 = vadd.xlane.f32.xlu1 %v1738_v11  ;;  %1733 = vadd.xlane.f32.xlu0 %v1732_v16  ;;  %v2400_v3 = vld [vmem:[%s3161_s26] ss:$0 sm:$0xff] }
 0x992   : > { %1864 = vmatpush.bf16.msra.mxu0 %v2226_v36  ;;  %2236 = vmatpush.bf16.msra.mxu1 %v2226_v36 }
 0x996   : > { %1865 = vmatpush.bf16.msra.mxu0 %v2225_v44  ;;  %2237 = vmatpush.bf16.msra.mxu1 %v2225_v44 }
 0x999   : > { %1742 = vadd.xlane.f32.xlu1 %v1741_v18  ;;  %1736 = vadd.xlane.f32.xlu0 %v1735_v19 }
 0xa04   : > { %v1740_v42 = vpop.xlane.xlu1 %1739  ;;  %v1734_v6 = vpop.xlane.xlu0 %1733 }
 0xa05   : > { %v1746_v60 = vmul.f32 %v1740_v42, %v2799_v55  ;;  %v1744_v20 = vmul.f32 %v1734_v6, %v2799_v55  ;;  %v2401_v6 = vld [vmem:[%s3162_s27] ss:$0 sm:$0xff] }
 0xa07   : > { %v3011_v46 = vsub.f32 %v1720_v12, %v1746_v60  ;;  %v3013_v22 = vsub.f32 %v1718_v7, %v1744_v20 }
 0xa09   : > { %v1754_v15 = vmul.f32 %v3011_v46, %v3011_v46  ;;  %v1752_v23 = vmul.f32 %v3013_v22, %v3013_v22 }
 0xa0b   : > { %v1762_v24 = vsel %vm861_vm14, %v1754_v15, 0.0  ;;  %v1756_v41 = vsel %vm861_vm14, %v1752_v23, 0.0 }
 0xa0c   : > { %v1743_v25 = vpop.xlane.xlu1 %1742  ;;  %1763 = vadd.xlane.f32.xlu0 %v1762_v24  ;;  %1757 = vadd.xlane.f32.xlu2 %v1756_v41  ;;  %v1737_v26 = vpop.xlane.xlu0 %1736 }
 0xa0d   : > { %v1747_v27 = vmul.f32 %v1743_v25, %v2799_v55  ;;  %v1745_v28 = vmul.f32 %v1737_v26, %v2799_v55 }
 0xa0f   : > { %v3023_v47 = vsub.f32 %v1721_v17, %v1747_v27  ;;  %v3025_v29 = vsub.f32 %v1719_v10, %v1745_v28 }
 0xa11   : > { %v1755_v45 = vmul.f32 %v3023_v47, %v3023_v47  ;;  %v1753_v31 = vmul.f32 %v3025_v29, %v3025_v29 }
 0xa13   : > { %v1765_v33 = vsel %vm861_vm14, %v1755_v45, 0.0  ;;  %v1759_v34 = vsel %vm861_vm14, %v1753_v31, 0.0 }
 0xa14   : > { %1766 = vadd.xlane.f32.xlu1 %v1765_v33  ;;  %1760 = vadd.xlane.f32.xlu2 %v1759_v34 }
 0xa7f   : > { %v1758_v37 = vpop.xlane.xlu2 %1757  ;;  %v1764_v39 = vpop.xlane.xlu0 %1763 }
 0xa80   : > { %v1768_v35 = vmul.f32 %v1758_v37, %v2799_v55  ;;  %v1770_v43 = vmul.f32 %v1764_v39, %v2799_v55 }
 0xa82   : > { %v1772_v32 = vadd.f32 1e-05, %v1768_v35  ;;  %v1774_v40 = vadd.f32 1e-05, %v1770_v43 }
 0xa84   : > { %2402 = vrsqrt.f32 %v1772_v32  ;;  %vm1802_vm13 = vweird.f32 %v1774_v40  ;;  %vm1782_vm15 = vweird.f32 %v1772_v32 }
 0xa85   : > { %2404 = vrsqrt.f32 %v1774_v40 }
 0xa87   : > { %v1767_v48 = vpop.xlane.xlu1 %1766  ;;  %v1761_v38 = vpop.xlane.xlu2 %1760 }
 0xa88   : > { %v1771_v49 = vmul.f32 %v1767_v48, %v2799_v55  ;;  %v1769_v50 = vmul.f32 %v1761_v38, %v2799_v55 }
 0xa8a   : > { %v2403_v52 = vpop.eup %2402  ;;  %v1775_v21 = vadd.f32 1e-05, %v1771_v49  ;;  %v1773_v53 = vadd.f32 1e-05, %v1769_v50 }
 0xa8b   : > { %v2405_v51 = vpop.eup %2404  ;;  %v1777_v54 = vmul.f32 %v2403_v52, %v1772_v32  ;;  %vm1783_vm12 = vweird.f32 %v2403_v52 }
 0xa8c   : > { %v1797_v56 = vmul.f32 %v2405_v51, %v1774_v40  ;;  %2406 = vrsqrt.f32 %v1775_v21  ;;  %vm1803_vm11 = vweird.f32 %v2405_v51  ;;  %vm1784_vm1 = vmor %vm1782_vm15, %vm1783_vm12  ;;  %vm1812_vm4 = vweird.f32 %v1775_v21 }
 0xa8d   : > { %v1778_v57 = vmul.f32 %v2403_v52, %v1777_v54  ;;  %2408 = vrsqrt.f32 %v1773_v53  ;;  %vm1804_vm0 = vmor %vm1802_vm13, %vm1803_vm11  ;;  %vm1792_vm6 = vweird.f32 %v1773_v53 }
 0xa8e   : > { %v1798_v58 = vmul.f32 %v2405_v51, %v1797_v56 }
 0xa8f   : > { %v1779_v59 = vmul.f32 0.5, %v1778_v57 }
 0xa90   : > { %v1799_v30 = vmul.f32 0.5, %v1798_v58 }
 0xa91   : > { %v1780_v62 = vsub.f32 1.5, %v1779_v59 }
 0xa92   : > { %v2407_v63 = vpop.eup %2406  ;;  %v1800_v0 = vsub.f32 1.5, %v1799_v30 }
 0xa93   : > { %v2409_v1 = vpop.eup %2408  ;;  %v1807_v2 = vmul.f32 %v2407_v63, %v1775_v21  ;;  %v1781_v4 = vmul.f32 %v2403_v52, %v1780_v62  ;;  %vm1813_vm2 = vweird.f32 %v2407_v63 }
 0xa94   : > { %v1801_v55 = vmul.f32 %v2405_v51, %v1800_v0  ;;  %v1787_v5 = vmul.f32 %v2409_v1, %v1773_v53  ;;  %vm1793_vm3 = vweird.f32 %v2409_v1  ;;  %vm1814_vm5 = vmor %vm1812_vm4, %vm1813_vm2 }
 0xa95   : > { %v1808_v7 = vmul.f32 %v2407_v63, %v1807_v2  ;;  %v1785_v61 = vsel %vm1784_vm1, %v2403_v52, %v1781_v4  ;;  %vm1794_vm7 = vmor %vm1792_vm6, %vm1793_vm3 }
 0xa96   : > { %v1788_v8 = vmul.f32 %v2409_v1, %v1787_v5  ;;  %v1805_v9 = vsel %vm1804_vm0, %v2405_v51, %v1801_v55  ;;  %v1816_v16 = vmul.f32 %v1785_v61, %v3013_v22 }
 0xa97   : > { %v1809_v10 = vmul.f32 0.5, %v1808_v7  ;;  %v1818_v17 = vmul.f32 %v1805_v9, %v3011_v46 }
 0xa98   : > { %v1789_v13 = vmul.f32 0.5, %v1788_v8  ;;  %v1823_v15 = vmul.f32 %v2400_v3, %v1816_v16 }
 0xa99   : > { %v1810_v12 = vsub.f32 1.5, %v1809_v10  ;;  %v1825_v20 = vmul.f32 %v2400_v3, %v1818_v17 }
 0xa9a   : > { %v1790_v14 = vsub.f32 1.5, %v1789_v13  ;;  %v1830_v25 = vadd.f32 %v2401_v6, %v1823_v15 }
 0xa9b   : > { %v1811_v11 = vmul.f32 %v2407_v63, %v1810_v12  ;;  %v1832_v24 = vadd.f32 %v2401_v6, %v1825_v20 }
 0xa9c   : > { %v1791_v18 = vmul.f32 %v2409_v1, %v1790_v14 }
 0xa9d   : > { %v1815_v19 = vsel %vm1814_vm5, %v2407_v63, %v1811_v11 }
 0xa9e   : > { %v1795_v42 = vsel %vm1794_vm7, %v2409_v1, %v1791_v18  ;;  %v1819_v60 = vmul.f32 %v1815_v19, %v3023_v47 }
 0xa9f   : > { %v1817_v46 = vmul.f32 %v1795_v42, %v3025_v29 }
 0xaa0   : > { %v1826_v23 = vmul.f32 %v2400_v3, %v1819_v60 }
 0xaa1   : > { %v1824_v22 = vmul.f32 %v2400_v3, %v1817_v46 }
 0xaa2   : > { %v1833_v41 = vadd.f32 %v2401_v6, %v1826_v23 }
 0xaa3   : > { %v1831_v26 = vadd.f32 %v2401_v6, %v1824_v22 }
 0xaa4   : > { %v1835_v27 = vpack.c.bf16 %v1833_v41, %v1832_v24 }
 0xaa5   : > { %v1834_v28 = vpack.c.bf16 %v1831_v26, %v1830_v25 }
 0xaa6   : > { %2190 = vmatmul.msk.bf16.vlgmr.msra.gmra.mxu1 %vm861_vm14, %v1835_v27 }
 0xaa7   : > { %2189 = vmatmul.msk.bf16.vlgmr.msra.gmra.mxu0 %vm861_vm14, %v1834_v28 }
 0xb23   : > { %v1872_v47 = vpop.f32.mrf.mxu1 }
 0xb24   : > { %v1867_v45 = vpop.f32.mrf.mxu0  ;;  %1879 = vst [vmem:[%s2715_s7 + $0x10] sm:$0xff] %v1872_v47 }
 0xb25   : > { %1877 = vst [vmem:[%s2715_s7] sm:$0xff] %v1867_v45 }
 0xb2b   : > { %v1874_v29 = vpop.f32.mrf.mxu1 }
 0xb2c   : > { %v1869_v31 = vpop.f32.mrf.mxu0  ;;  %1880 = vst [vmem:[%s2715_s7 + $0x18] sm:$0xff] %v1874_v29 }
 0xb2d   : > { %1878 = vst [vmem:[%s2715_s7 + $0x8] sm:$0xff] %v1869_v31 }
 0xb2e PF: > { %s3163_s13 = sld [smem:[#allocation9_spill]]  ;;  %s1894_s12 = sshll.u32 %s2715_s7, 4  ;;  %s1895_s12 = int_to_ptr.vmem [resolvable:$true] %s1894_s12 }
 0xb2f   : > { %s3164_s14 = sld [smem:[#allocation7_spill]] }
 0xb30   : > { %s3166_s28 = sld [smem:[#allocation24_spill]] }
 0xb34   : > { %s2227_s0 = sshll.u32 %s3163_s13, 5 }
 0xb35   : > { %s3167_s21 = sand.u32 1, %s3164_s14  }
 0xb36   : > { %s1893_s24 = scalar_lea.hbm %s3166_s28, %s2227_s0  ;;  %s1882_s16 = scalar_lea.sflag [#allocation4], %s3167_s21 }
 0xb37   : > { %s1896_s20 = sshll.u32 %s1893_s24, 4  ;;  %s2430_s26 = scalar_lea.hbm %s3166_s28, 64  ;;  %s1897_s20 = int_to_ptr.hbm [resolvable:$true] %s1896_s20 }
 0xb38   : > { %s2424_s15 = sshra.s32 %s1897_s20, 4  ;;  %s2425_s15 = int_to_ptr.hbm [resolvable:$true] %s2424_s15 }
 0xb39   : > { %s2426_s22 = scalar_lea.hbm %s2425_s15, 32  ;;  %p2431_p6 = scmp.lt.s32.totalorder %s2425_s15, %s3166_s28 }
 0xb3a   : > { %p2427_p2 = scmp.ne.s32.totalorder %s2425_s15, %s2426_s22  ;;  %p2432_p7 = scmp.lt.s32.totalorder %s2430_s26, %s2426_s22 }
 0xb3c   : > { %p2428_p4 = pnand %p2427_p2, %p2645_p3  ;;  %p2433_p8 = por %p2432_p7, %p2431_p6 }
 0xb3e   : > { %p2429_p5 = pneg %p2428_p4 }
 0xb40   : > { %p2434_p10 = pnand %p2433_p8, %p2429_p5 }
 0xb42   : > { %2437 = shalt.err (!%p2434_p10)
}
 0xb43   : > { %s2514_s7 = smov 128   ;;  %s2515_s27 = smov 8  }
 0xb44   : > { %2238 = dma.vmem_to_hbm [thread:$0]  (%p2645_p3), %s1895_s12, 512, %s1897_s20, %s1882_s16, %s2514_s7, %s2514_s7, %s2515_s27  }
 0xb45 PF: > { %s3168_s13 = sld [smem:[#allocation12_spill]] }
 0xb46   : > { %s3169_s14 = sld [smem:[#allocation6_spill]] }
 0xb4b   : > { %p2244_p11 = scmp.ge.s32.totalorder %s3168_s13, 2 }
 0xb4c   : > { %s1911_s5 = sand.u32 1, %s3169_s14  }
 0xb4d   : > { %p2241_p12 = pnand %p2244_p11, %p2655_p9  ;;  %s1912_s19 = scalar_lea.sflag [#allocation4], %s1911_s5 }
 0xb4f   : > { %p2242_p13 = pneg %p2241_p12 }
 0xb51   : > { %2471 = dma.done.wait (%p2242_p13), %s1912_s19, 512  }
 0xb52   : > { %2473 = vsyncadd (%p2242_p13), %s1912_s19, 4294966784  ;;  %s28_s25 = sadd.s32 1, %s3168_s13   ;;  %s3171_s18 = sld [smem:[#allocation7_spill]] }
 0xb53   : > { %p25_p0 = scmp.ge.s32.totalorder %s28_s25, 6   ;;  %s3172_s19 = sld [smem:[#allocation8_spill]] }
 0xb54   : > { %s3173_s20 = sld [smem:[#allocation17_spill]] }
 0xb55   : > { %s3174_s21 = sld [smem:[#allocation10_spill]]  ;;  %27 = sbr.rel (!%p25_p0) target bundleno = 13 (0xd), region = 144 }
 0xb56   : > { %s3175_s22 = sld [smem:[#allocation11_spill]] }
 0xb57   : > { %s3176_s23 = sld [smem:[#allocation13_spill]] }
 0xb58   : > { %s3177_s24 = sld [smem:[#allocation15_spill]] }
 0xb5a   :  { %1918 = vsyncpa [#allocation4], 1 }
 0xb5b   :  { %1920 = vsyncpa [#allocation4 + $0x1], 1 }

</bundles_post_ra>
